<compile_context>
chip_gen: v7x
topology: tpu7x:2x2x1
jax: 0.10.0
libtpu: 0.0.40
codegen_flags: <defaults>
</compile_context>

<pallas_src>
import jax
import jax.numpy as jnp
from jax.experimental import pallas as pl
from jax.experimental.pallas import tpu as pltpu


def _round_up(x, m):
    return ((x + m - 1) // m) * m


def latlayer_pallas(x_nchw, w1, b1, w2, b2):
    """LatLayer forward.

    x_nchw: (B, C, H, W)   input, NCHW (PyTorch layout)
    w1    : (64, C, 3, 3)  conv1 weight, OIHW
    b1    : (64,)          conv1 bias
    w2    : (64, 64, 3, 3) conv2 weight, OIHW
    b2    : (64,)          conv2 bias
    returns (B, 64, H, W)
    """
    B, C, H, W = x_nchw.shape
    O = w1.shape[0]                       # 64
    Wp = W + 2                            # padded width
    L = H * Wp                            # true compute length (H rows x Wp cols)
    Lpad = _round_up(L, 128)              # lane-dense compute width
    S_MAX = 2 * Wp + 2                    # largest tap lane offset
    HPW = S_MAX + Lpad                    # width of padded-intermediate scratch
    Lx = _round_up(max(S_MAX + Lpad, (H + 3) * Wp), 128)  # flattened input width
    K1 = 9 * C
    K2 = 9 * O
    KMAX = max(K1, K2)

    # ---- wrapper-side glue (cheap XLA ops) --------------------------------
    # zero spatial padding (padding=1) + one slack row, flatten spatial to the
    # lane axis, then zero-extend to Lx so every tap slice of length Lpad is
    # in bounds. Cast to bf16 for the MXU (halves the DMA'd block too).
    x_pad = jnp.pad(x_nchw, ((0, 0), (0, 0), (1, 2), (1, 1)))
    x_flat = x_pad.reshape(B, C, (H + 3) * Wp)
    x_flat = jnp.pad(x_flat, ((0, 0), (0, 0), (0, Lx - (H + 3) * Wp)))
    x_flat = x_flat.astype(jnp.bfloat16)

    # folded im2col weights: w_fold[o, (dy*3+dx)*Cin + i] = w[o, i, dy, dx]
    w1_fold = jnp.transpose(w1, (0, 2, 3, 1)).reshape(O, K1).astype(jnp.bfloat16)
    w2_fold = jnp.transpose(w2, (0, 2, 3, 1)).reshape(O, K2).astype(jnp.bfloat16)
    b1_c = b1.reshape(O, 1).astype(jnp.float32)
    b2_c = b2.reshape(O, 1).astype(jnp.float32)

    # valid-column mask: zero the wraparound columns (col % Wp >= W) AND the
    # lane-alignment tail (col >= L). These zeros become exactly the left /
    # right / bottom zero padding the conv2 im2col needs.
    col = jnp.arange(Lpad, dtype=jnp.int32)
    mask = ((col < L) & ((col % Wp) < W)).astype(jnp.float32).reshape(1, Lpad)

    def kernel(x_ref, w1_ref, b1_ref, w2_ref, b2_ref, m_ref,
               o_ref, patch_ref, hpad_ref):
        # x_ref    : (1, C, Lx)   bf16 flattened zero-padded input (one batch)
        # w1_ref   : (O, 9*C)     bf16 folded conv1 weights
        # b1_ref   : (O, 1)       f32
        # w2_ref   : (O, 9*O)     bf16 folded conv2 weights (lane-dense 2-D)
        # b2_ref   : (O, 1)       f32
        # m_ref    : (1, Lpad)    f32 valid-column mask
        # o_ref    : (1, O, Lpad)
        # patch_ref: (KMAX, Lpad) bf16 shared im2col scratch (conv1 & conv2)
        # hpad_ref : (O, HPW)     bf16 zero-padded intermediate scratch
        x = x_ref[0]                                           # (C, Lx) bf16

        # ---- conv1: im2col (9 sublane-offset stores) + ONE MXU matmul -----
        for t in range(9):
            dy, dx = divmod(t, 3)
            s = dy * Wp + dx
            patch_ref[t * C:(t + 1) * C, :] = x[:, s:s + Lpad]
        h = jnp.dot(w1_ref[...], patch_ref[0:K1, :],
                    preferred_element_type=jnp.float32)        # (O, Lpad) f32
        h = jnp.maximum(h + b1_ref[...], 0.0) * m_ref[...]     # bias+ReLU+mask

        # ---- scatter into the zero-padded intermediate --------------------
        # Only the borders need zeroing; the interior is fully overwritten
        # (masked columns of h supply the interior zero padding).
        hpad_ref[:, 0:Wp + 1] = jnp.zeros((O, Wp + 1), jnp.bfloat16)
        hpad_ref[:, Wp + 1 + Lpad:HPW] = jnp.zeros(
            (O, HPW - (Wp + 1 + Lpad)), jnp.bfloat16)
        hpad_ref[:, Wp + 1:Wp + 1 + Lpad] = h.astype(jnp.bfloat16)

        # ---- conv2: im2col + ONE MXU matmul (K = 576) ----------------------
        for t in range(9):
            dy, dx = divmod(t, 3)
            s = dy * Wp + dx
            patch_ref[t * O:(t + 1) * O, :] = hpad_ref[:, s:s + Lpad]
        acc = jnp.dot(w2_ref[...], patch_ref[0:K2, :],
                      preferred_element_type=jnp.float32)       # (O, Lpad) f32
        acc = acc + b2_ref[...]
        o_ref[...] = acc.reshape(1, O, Lpad).astype(o_ref.dtype)

    out_flat = pl.pallas_call(
        kernel,
        out_shape=jax.ShapeDtypeStruct((B, O, Lpad), x_nchw.dtype),
        grid_spec=pltpu.PrefetchScalarGridSpec(
            num_scalar_prefetch=0,
            grid=(B,),
            in_specs=[
                pl.BlockSpec((1, C, Lx), lambda b: (b, 0, 0)),
                pl.BlockSpec((O, K1), lambda b: (0, 0)),
                pl.BlockSpec((O, 1), lambda b: (0, 0)),
                pl.BlockSpec((O, K2), lambda b: (0, 0)),
                pl.BlockSpec((O, 1), lambda b: (0, 0)),
                pl.BlockSpec((1, Lpad), lambda b: (0, 0)),
            ],
            out_specs=pl.BlockSpec((1, O, Lpad), lambda b: (b, 0, 0)),
            scratch_shapes=[
                pltpu.VMEM((KMAX, Lpad), jnp.bfloat16),
                pltpu.VMEM((O, HPW), jnp.bfloat16),
            ],
        ),
        compiler_params=pltpu.CompilerParams(
            dimension_semantics=("parallel",),
            vmem_limit_bytes=64 * 1024 * 1024),
    )(x_flat, w1_fold, b1_c, w2_fold, b2_c, mask)

    # drop the lane-padding tail and the wraparound columns, restore NCHW.
    # (Keep this out of any benchmarked region; it is a pure layout crop.)
    return out_flat[:, :, :L].reshape(B, O, H, Wp)[:, :, :, :W]


def _reference(x, w1, b1, w2, b2):
    """Pure-JAX NCHW reference of the PyTorch forward pass (f32)."""
    dn = ("NCHW", "OIHW", "NCHW")
    h = jax.lax.conv_general_dilated(
        x, w1, (1, 1), "SAME", dimension_numbers=dn,
        precision=jax.lax.Precision.HIGHEST)
    h = jnp.maximum(h + b1[None, :, None, None], 0.0)
    y = jax.lax.conv_general_dilated(
        h, w2, (1, 1), "SAME", dimension_numbers=dn,
        precision=jax.lax.Precision.HIGHEST)
    return y + b2[None, :, None, None]


if __name__ == "__main__":
    # Small shapes consistent with the module (LatLayer(in_channel=16)).
    B, C, H, W = 2, 16, 16, 16
    O = 64

    key = jax.random.PRNGKey(0)
    kx, k1, kb1, k2, kb2 = jax.random.split(key, 5)

    x = jax.random.normal(kx, (B, C, H, W), dtype=jnp.float32)
    w1 = jax.random.normal(k1, (O, C, 3, 3), dtype=jnp.float32) * 0.1
    b1 = jax.random.normal(kb1, (O,), dtype=jnp.float32) * 0.1
    w2 = jax.random.normal(k2, (O, O, 3, 3), dtype=jnp.float32) * 0.05
    b2 = jax.random.normal(kb2, (O,), dtype=jnp.float32) * 0.1

    out = jax.block_until_ready(latlayer_pallas(x, w1, b1, w2, b2))
    ref = jax.block_until_ready(_reference(x, w1, b1, w2, b2))

    assert out.shape == (B, O, H, W)
    max_err = float(jnp.max(jnp.abs(out - ref)))
    # bf16 MXU operands with f32 accumulation -> tolerance relaxed vs pure f32.
    assert jnp.allclose(out, ref, atol=5e-2, rtol=5e-2), (
        "mismatch vs reference, max abs err = %g" % max_err)

    print("KERNEL_OK")
</pallas_src>

<mosaic_0001>
module attributes {stable_mosaic.version = 11 : i64} {
  func.func @kernel(%arg0: i32, %arg1: memref<1x16x512xbf16, #tpu.memory_space<vmem>>, %arg2: memref<64x144xbf16, #tpu.memory_space<vmem>>, %arg3: memref<64x1xf32, #tpu.memory_space<vmem>>, %arg4: memref<64x576xbf16, #tpu.memory_space<vmem>>, %arg5: memref<64x1xf32, #tpu.memory_space<vmem>>, %arg6: memref<1x384xf32, #tpu.memory_space<vmem>>, %arg7: memref<1x64x384xf32, #tpu.memory_space<vmem>>, %arg8: memref<576x384xbf16, #tpu.memory_space<vmem>>, %arg9: memref<64x422xbf16, #tpu.memory_space<vmem>>) attributes {dimension_semantics = [#tpu.dimension_semantics<parallel>], iteration_bounds = array<i64: 2>, scalar_prefetch = 0 : i64, scratch_operands = 2 : i64, tpu.core_type = #tpu.core_type<tc>, window_params = [{transform_indices = @transform_0, window_bounds = array<i64: 1, 16, 512>}, {pipeline_mode = #tpu.pipeline_mode<synchronous>, transform_indices = @transform_1, window_bounds = array<i64: 64, 144>}, {pipeline_mode = #tpu.pipeline_mode<synchronous>, transform_indices = @transform_2, window_bounds = array<i64: 64, 1>}, {pipeline_mode = #tpu.pipeline_mode<synchronous>, transform_indices = @transform_3, window_bounds = array<i64: 64, 576>}, {pipeline_mode = #tpu.pipeline_mode<synchronous>, transform_indices = @transform_4, window_bounds = array<i64: 64, 1>}, {pipeline_mode = #tpu.pipeline_mode<synchronous>, transform_indices = @transform_5, window_bounds = array<i64: 1, 384>}, {transform_indices = @transform_6, window_bounds = array<i64: 1, 64, 384>}]} {
    %c0 = arith.constant 0 : index
    %c0_0 = arith.constant 0 : index
    %c0_1 = arith.constant 0 : index
    %0 = vector.load %arg1[%c0, %c0_0, %c0_1] : memref<1x16x512xbf16, #tpu.memory_space<vmem>>, vector<1x16x512xbf16>
    %1 = vector.shape_cast %0 : vector<1x16x512xbf16> to vector<16x512xbf16>
    %2 = vector.extract_strided_slice %1 {offsets = [0, 0], sizes = [16, 384], strides = [1, 1]} : vector<16x512xbf16> to vector<16x384xbf16>
    %c0_2 = arith.constant 0 : index
    %c0_3 = arith.constant 0 : index
    %3 = vector.load %arg8[%c0_2, %c0_3] : memref<576x384xbf16, #tpu.memory_space<vmem>>, vector<16x384xbf16>
    tpu.vector_store %arg8[%c0_2, %c0_3], %2 {strides = array<i32>} : memref<576x384xbf16, #tpu.memory_space<vmem>>, vector<16x384xbf16>,
    %4 = vector.extract_strided_slice %1 {offsets = [0, 1], sizes = [16, 384], strides = [1, 1]} : vector<16x512xbf16> to vector<16x384xbf16>
    %c16 = arith.constant 16 : index
    %c0_4 = arith.constant 0 : index
    %5 = vector.load %arg8[%c16, %c0_4] : memref<576x384xbf16, #tpu.memory_space<vmem>>, vector<16x384xbf16>
    tpu.vector_store %arg8[%c16, %c0_4], %4 {strides = array<i32>} : memref<576x384xbf16, #tpu.memory_space<vmem>>, vector<16x384xbf16>,
    %6 = vector.extract_strided_slice %1 {offsets = [0, 2], sizes = [16, 384], strides = [1, 1]} : vector<16x512xbf16> to vector<16x384xbf16>
    %c32 = arith.constant 32 : index
    %c0_5 = arith.constant 0 : index
    %7 = vector.load %arg8[%c32, %c0_5] : memref<576x384xbf16, #tpu.memory_space<vmem>>, vector<16x384xbf16>
    tpu.vector_store %arg8[%c32, %c0_5], %6 {strides = array<i32>} : memref<576x384xbf16, #tpu.memory_space<vmem>>, vector<16x384xbf16>,
    %8 = vector.extract_strided_slice %1 {offsets = [0, 18], sizes = [16, 384], strides = [1, 1]} : vector<16x512xbf16> to vector<16x384xbf16>
    %c48 = arith.constant 48 : index
    %c0_6 = arith.constant 0 : index
    %9 = vector.load %arg8[%c48, %c0_6] : memref<576x384xbf16, #tpu.memory_space<vmem>>, vector<16x384xbf16>
    tpu.vector_store %arg8[%c48, %c0_6], %8 {strides = array<i32>} : memref<576x384xbf16, #tpu.memory_space<vmem>>, vector<16x384xbf16>,
    %10 = vector.extract_strided_slice %1 {offsets = [0, 19], sizes = [16, 384], strides = [1, 1]} : vector<16x512xbf16> to vector<16x384xbf16>
    %c64 = arith.constant 64 : index
    %c0_7 = arith.constant 0 : index
    %11 = vector.load %arg8[%c64, %c0_7] : memref<576x384xbf16, #tpu.memory_space<vmem>>, vector<16x384xbf16>
    tpu.vector_store %arg8[%c64, %c0_7], %10 {strides = array<i32>} : memref<576x384xbf16, #tpu.memory_space<vmem>>, vector<16x384xbf16>,
    %12 = vector.extract_strided_slice %1 {offsets = [0, 20], sizes = [16, 384], strides = [1, 1]} : vector<16x512xbf16> to vector<16x384xbf16>
    %c80 = arith.constant 80 : index
    %c0_8 = arith.constant 0 : index
    %13 = vector.load %arg8[%c80, %c0_8] : memref<576x384xbf16, #tpu.memory_space<vmem>>, vector<16x384xbf16>
    tpu.vector_store %arg8[%c80, %c0_8], %12 {strides = array<i32>} : memref<576x384xbf16, #tpu.memory_space<vmem>>, vector<16x384xbf16>,
    %14 = vector.extract_strided_slice %1 {offsets = [0, 36], sizes = [16, 384], strides = [1, 1]} : vector<16x512xbf16> to vector<16x384xbf16>
    %c96 = arith.constant 96 : index
    %c0_9 = arith.constant 0 : index
    %15 = vector.load %arg8[%c96, %c0_9] : memref<576x384xbf16, #tpu.memory_space<vmem>>, vector<16x384xbf16>
    tpu.vector_store %arg8[%c96, %c0_9], %14 {strides = array<i32>} : memref<576x384xbf16, #tpu.memory_space<vmem>>, vector<16x384xbf16>,
    %16 = vector.extract_strided_slice %1 {offsets = [0, 37], sizes = [16, 384], strides = [1, 1]} : vector<16x512xbf16> to vector<16x384xbf16>
    %c112 = arith.constant 112 : index
    %c0_10 = arith.constant 0 : index
    %17 = vector.load %arg8[%c112, %c0_10] : memref<576x384xbf16, #tpu.memory_space<vmem>>, vector<16x384xbf16>
    tpu.vector_store %arg8[%c112, %c0_10], %16 {strides = array<i32>} : memref<576x384xbf16, #tpu.memory_space<vmem>>, vector<16x384xbf16>,
    %18 = vector.extract_strided_slice %1 {offsets = [0, 38], sizes = [16, 384], strides = [1, 1]} : vector<16x512xbf16> to vector<16x384xbf16>
    %c128 = arith.constant 128 : index
    %c0_11 = arith.constant 0 : index
    %19 = vector.load %arg8[%c128, %c0_11] : memref<576x384xbf16, #tpu.memory_space<vmem>>, vector<16x384xbf16>
    tpu.vector_store %arg8[%c128, %c0_11], %18 {strides = array<i32>} : memref<576x384xbf16, #tpu.memory_space<vmem>>, vector<16x384xbf16>,
    %c0_12 = arith.constant 0 : index
    %c0_13 = arith.constant 0 : index
    %20 = vector.load %arg2[%c0_12, %c0_13] : memref<64x144xbf16, #tpu.memory_space<vmem>>, vector<64x144xbf16>
    %c0_14 = arith.constant 0 : index
    %c0_15 = arith.constant 0 : index
    %21 = vector.load %arg8[%c0_14, %c0_15] : memref<576x384xbf16, #tpu.memory_space<vmem>>, vector<144x384xbf16>
    %cst = arith.constant dense<0.000000e+00> : vector<64x384xf32>
    %22 = tpu.matmul %20, %21, %cst {dimension_numbers = #tpu.dot_dimension_numbers<[1], [0], [0], [1], [0, 0, 1, 1], [], []>} : vector<64x144xbf16>, vector<144x384xbf16>, vector<64x384xf32> -> vector<64x384xf32>
    %c0_16 = arith.constant 0 : index
    %c0_17 = arith.constant 0 : index
    %23 = vector.load %arg3[%c0_16, %c0_17] : memref<64x1xf32, #tpu.memory_space<vmem>>, vector<64x1xf32>
    %24 = vector.broadcast %23 : vector<64x1xf32> to vector<64x384xf32>
    %25 = arith.addf %22, %24 : vector<64x384xf32>
    %cst_18 = arith.constant 0.000000e+00 : f32
    %26 = vector.broadcast %cst_18 : f32 to vector<64x384xf32>
    %27 = arith.maximumf %25, %26 : vector<64x384xf32>
    %c0_19 = arith.constant 0 : index
    %c0_20 = arith.constant 0 : index
    %28 = vector.load %arg6[%c0_19, %c0_20] : memref<1x384xf32, #tpu.memory_space<vmem>>, vector<1x384xf32>
    %29 = vector.broadcast %28 : vector<1x384xf32> to vector<64x384xf32>
    %30 = arith.mulf %27, %29 : vector<64x384xf32>
    %cst_21 = arith.constant 0.000000e+00 : bf16
    %31 = vector.broadcast %cst_21 : bf16 to vector<64x19xbf16>
    %c0_22 = arith.constant 0 : index
    %c0_23 = arith.constant 0 : index
    %32 = vector.load %arg9[%c0_22, %c0_23] : memref<64x422xbf16, #tpu.memory_space<vmem>>, vector<64x19xbf16>
    tpu.vector_store %arg9[%c0_22, %c0_23], %31 {strides = array<i32>} : memref<64x422xbf16, #tpu.memory_space<vmem>>, vector<64x19xbf16>,
    %cst_24 = arith.constant 0.000000e+00 : bf16
    %33 = vector.broadcast %cst_24 : bf16 to vector<64x19xbf16>
    %c0_25 = arith.constant 0 : index
    %c403 = arith.constant 403 : index
    %34 = vector.load %arg9[%c0_25, %c403] : memref<64x422xbf16, #tpu.memory_space<vmem>>, vector<64x19xbf16>
    tpu.vector_store %arg9[%c0_25, %c403], %33 {strides = array<i32>} : memref<64x422xbf16, #tpu.memory_space<vmem>>, vector<64x19xbf16>,
    %35 = arith.truncf %30 : vector<64x384xf32> to vector<64x384xbf16>
    %c0_26 = arith.constant 0 : index
    %c19 = arith.constant 19 : index
    %36 = vector.load %arg9[%c0_26, %c19] : memref<64x422xbf16, #tpu.memory_space<vmem>>, vector<64x384xbf16>
    tpu.vector_store %arg9[%c0_26, %c19], %35 {strides = array<i32>} : memref<64x422xbf16, #tpu.memory_space<vmem>>, vector<64x384xbf16>,
    %c0_27 = arith.constant 0 : index
    %c0_28 = arith.constant 0 : index
    %37 = vector.load %arg9[%c0_27, %c0_28] : memref<64x422xbf16, #tpu.memory_space<vmem>>, vector<64x384xbf16>
    %c0_29 = arith.constant 0 : index
    %c0_30 = arith.constant 0 : index
    %38 = vector.load %arg8[%c0_29, %c0_30] : memref<576x384xbf16, #tpu.memory_space<vmem>>, vector<64x384xbf16>
    tpu.vector_store %arg8[%c0_29, %c0_30], %37 {strides = array<i32>} : memref<576x384xbf16, #tpu.memory_space<vmem>>, vector<64x384xbf16>,
    %c0_31 = arith.constant 0 : index
    %c1 = arith.constant 1 : index
    %39 = vector.load %arg9[%c0_31, %c1] : memref<64x422xbf16, #tpu.memory_space<vmem>>, vector<64x384xbf16>
    %c64_32 = arith.constant 64 : index
    %c0_33 = arith.constant 0 : index
    %40 = vector.load %arg8[%c64_32, %c0_33] : memref<576x384xbf16, #tpu.memory_space<vmem>>, vector<64x384xbf16>
    tpu.vector_store %arg8[%c64_32, %c0_33], %39 {strides = array<i32>} : memref<576x384xbf16, #tpu.memory_space<vmem>>, vector<64x384xbf16>,
    %c0_34 = arith.constant 0 : index
    %c2 = arith.constant 2 : index
    %41 = vector.load %arg9[%c0_34, %c2] : memref<64x422xbf16, #tpu.memory_space<vmem>>, vector<64x384xbf16>
    %c128_35 = arith.constant 128 : index
    %c0_36 = arith.constant 0 : index
    %42 = vector.load %arg8[%c128_35, %c0_36] : memref<576x384xbf16, #tpu.memory_space<vmem>>, vector<64x384xbf16>
    tpu.vector_store %arg8[%c128_35, %c0_36], %41 {strides = array<i32>} : memref<576x384xbf16, #tpu.memory_space<vmem>>, vector<64x384xbf16>,
    %c0_37 = arith.constant 0 : index
    %c18 = arith.constant 18 : index
    %43 = vector.load %arg9[%c0_37, %c18] : memref<64x422xbf16, #tpu.memory_space<vmem>>, vector<64x384xbf16>
    %c192 = arith.constant 192 : index
    %c0_38 = arith.constant 0 : index
    %44 = vector.load %arg8[%c192, %c0_38] : memref<576x384xbf16, #tpu.memory_space<vmem>>, vector<64x384xbf16>
    tpu.vector_store %arg8[%c192, %c0_38], %43 {strides = array<i32>} : memref<576x384xbf16, #tpu.memory_space<vmem>>, vector<64x384xbf16>,
    %c0_39 = arith.constant 0 : index
    %c19_40 = arith.constant 19 : index
    %45 = vector.load %arg9[%c0_39, %c19_40] : memref<64x422xbf16, #tpu.memory_space<vmem>>, vector<64x384xbf16>
    %c256 = arith.constant 256 : index
    %c0_41 = arith.constant 0 : index
    %46 = vector.load %arg8[%c256, %c0_41] : memref<576x384xbf16, #tpu.memory_space<vmem>>, vector<64x384xbf16>
    tpu.vector_store %arg8[%c256, %c0_41], %45 {strides = array<i32>} : memref<576x384xbf16, #tpu.memory_space<vmem>>, vector<64x384xbf16>,
    %c0_42 = arith.constant 0 : index
    %c20 = arith.constant 20 : index
    %47 = vector.load %arg9[%c0_42, %c20] : memref<64x422xbf16, #tpu.memory_space<vmem>>, vector<64x384xbf16>
    %c320 = arith.constant 320 : index
    %c0_43 = arith.constant 0 : index
    %48 = vector.load %arg8[%c320, %c0_43] : memref<576x384xbf16, #tpu.memory_space<vmem>>, vector<64x384xbf16>
    tpu.vector_store %arg8[%c320, %c0_43], %47 {strides = array<i32>} : memref<576x384xbf16, #tpu.memory_space<vmem>>, vector<64x384xbf16>,
    %c0_44 = arith.constant 0 : index
    %c36 = arith.constant 36 : index
    %49 = vector.load %arg9[%c0_44, %c36] : memref<64x422xbf16, #tpu.memory_space<vmem>>, vector<64x384xbf16>
    %c384 = arith.constant 384 : index
    %c0_45 = arith.constant 0 : index
    %50 = vector.load %arg8[%c384, %c0_45] : memref<576x384xbf16, #tpu.memory_space<vmem>>, vector<64x384xbf16>
    tpu.vector_store %arg8[%c384, %c0_45], %49 {strides = array<i32>} : memref<576x384xbf16, #tpu.memory_space<vmem>>, vector<64x384xbf16>,
    %c0_46 = arith.constant 0 : index
    %c37 = arith.constant 37 : index
    %51 = vector.load %arg9[%c0_46, %c37] : memref<64x422xbf16, #tpu.memory_space<vmem>>, vector<64x384xbf16>
    %c448 = arith.constant 448 : index
    %c0_47 = arith.constant 0 : index
    %52 = vector.load %arg8[%c448, %c0_47] : memref<576x384xbf16, #tpu.memory_space<vmem>>, vector<64x384xbf16>
    tpu.vector_store %arg8[%c448, %c0_47], %51 {strides = array<i32>} : memref<576x384xbf16, #tpu.memory_space<vmem>>, vector<64x384xbf16>,
    %c0_48 = arith.constant 0 : index
    %c38 = arith.constant 38 : index
    %53 = vector.load %arg9[%c0_48, %c38] : memref<64x422xbf16, #tpu.memory_space<vmem>>, vector<64x384xbf16>
    %c512 = arith.constant 512 : index
    %c0_49 = arith.constant 0 : index
    %54 = vector.load %arg8[%c512, %c0_49] : memref<576x384xbf16, #tpu.memory_space<vmem>>, vector<64x384xbf16>
    tpu.vector_store %arg8[%c512, %c0_49], %53 {strides = array<i32>} : memref<576x384xbf16, #tpu.memory_space<vmem>>, vector<64x384xbf16>,
    %c0_50 = arith.constant 0 : index
    %c0_51 = arith.constant 0 : index
    %55 = vector.load %arg4[%c0_50, %c0_51] : memref<64x576xbf16, #tpu.memory_space<vmem>>, vector<64x576xbf16>
    %c0_52 = arith.constant 0 : index
    %c0_53 = arith.constant 0 : index
    %56 = vector.load %arg8[%c0_52, %c0_53] : memref<576x384xbf16, #tpu.memory_space<vmem>>, vector<576x384xbf16>
    %cst_54 = arith.constant dense<0.000000e+00> : vector<64x384xf32>
    %57 = tpu.matmul %55, %56, %cst_54 {dimension_numbers = #tpu.dot_dimension_numbers<[1], [0], [0], [1], [0, 0, 1, 1], [], []>} : vector<64x576xbf16>, vector<576x384xbf16>, vector<64x384xf32> -> vector<64x384xf32>
    %c0_55 = arith.constant 0 : index
    %c0_56 = arith.constant 0 : index
    %58 = vector.load %arg5[%c0_55, %c0_56] : memref<64x1xf32, #tpu.memory_space<vmem>>, vector<64x1xf32>
    %59 = vector.broadcast %58 : vector<64x1xf32> to vector<64x384xf32>
    %60 = arith.addf %57, %59 : vector<64x384xf32>
    %61 = vector.shape_cast %60 : vector<64x384xf32> to vector<1x64x384xf32>
    %c0_57 = arith.constant 0 : index
    %c0_58 = arith.constant 0 : index
    %c0_59 = arith.constant 0 : index
    %62 = vector.load %arg7[%c0_57, %c0_58, %c0_59] : memref<1x64x384xf32, #tpu.memory_space<vmem>>, vector<1x64x384xf32>
    tpu.vector_store %arg7[%c0_57, %c0_58, %c0_59], %61 {strides = array<i32>} : memref<1x64x384xf32, #tpu.memory_space<vmem>>, vector<1x64x384xf32>,
    return
  }
  func.func @transform_0(%arg0: i32) -> (i32, i32, i32) {
    %c0_i32 = arith.constant 0 : i32
    %c0_i32_0 = arith.constant 0 : i32
    %c0_i32_1 = arith.constant 0 : i32
    return %arg0, %c0_i32, %c0_i32_0 : i32, i32, i32
  }
  func.func @transform_1(%arg0: i32) -> (i32, i32) {
    %c0_i32 = arith.constant 0 : i32
    %c0_i32_0 = arith.constant 0 : i32
    %c0_i32_1 = arith.constant 0 : i32
    return %c0_i32, %c0_i32_0 : i32, i32
  }
  func.func @transform_2(%arg0: i32) -> (i32, i32) {
    %c0_i32 = arith.constant 0 : i32
    %c0_i32_0 = arith.constant 0 : i32
    %c0_i32_1 = arith.constant 0 : i32
    return %c0_i32, %c0_i32_0 : i32, i32
  }
  func.func @transform_3(%arg0: i32) -> (i32, i32) {
    %c0_i32 = arith.constant 0 : i32
    %c0_i32_0 = arith.constant 0 : i32
    %c0_i32_1 = arith.constant 0 : i32
    return %c0_i32, %c0_i32_0 : i32, i32
  }
  func.func @transform_4(%arg0: i32) -> (i32, i32) {
    %c0_i32 = arith.constant 0 : i32
    %c0_i32_0 = arith.constant 0 : i32
    %c0_i32_1 = arith.constant 0 : i32
    return %c0_i32, %c0_i32_0 : i32, i32
  }
  func.func @transform_5(%arg0: i32) -> (i32, i32) {
    %c0_i32 = arith.constant 0 : i32
    %c0_i32_0 = arith.constant 0 : i32
    %c0_i32_1 = arith.constant 0 : i32
    return %c0_i32, %c0_i32_0 : i32, i32
  }
  func.func @transform_6(%arg0: i32) -> (i32, i32, i32) {
    %c0_i32 = arith.constant 0 : i32
    %c0_i32_0 = arith.constant 0 : i32
    %c0_i32_1 = arith.constant 0 : i32
    return %arg0, %c0_i32, %c0_i32_0 : i32, i32, i32
  }
}

</mosaic_0001>

<bundles_post_ra>
// kernel: tpu_custom_call.1
= control target key start
LH: loop header
LB: loop body
LE: loop exit
PB: predicated region body
PF: predicated region fallthrough
CT: control target
= control target key end

     0   :  { %11 = vsyncpa [#allocation5], 0  ;;  %s4586_s0 = inlined_call_operand.hbm [shape: bf16[2,16,512], index: 0, kind: input, shape index: {}]   ;;  %s4587_s1 = inlined_call_operand.hbm [shape: bf16[64,144], index: 1, kind: input, shape index: {}]   ;;  %s4588_s2 = inlined_call_operand.hbm [shape: f32[64,1], index: 2, kind: input, shape index: {}]   ;;  %s4589_s3 = inlined_call_operand.hbm [shape: bf16[64,576], index: 3, kind: input, shape index: {}]   ;;  %s4590_s4 = inlined_call_operand.hbm [shape: f32[64,1], index: 4, kind: input, shape index: {}]   ;;  %s4591_s5 = inlined_call_operand.hbm [shape: f32[1,384], index: 5, kind: input, shape index: {}]   ;;  %s4592_s6 = inlined_call_operand.hbm [shape: f32[2,64,384], index: 6, kind: output, shape index: {}]  }
   0x1   :  { %13 = vsyncpa [#allocation5 + $0x1], 0 }
   0x2   :  { %14 = vsyncpa [#allocation8], 0 }
   0x3   :  { %15 = vsyncpa [#allocation11], 0 }
   0x4   :  { %16 = vsyncpa [#allocation14], 0 }
   0x5   :  { %17 = vsyncpa [#allocation6], 0 }
   0x6   :  { %19 = vsyncpa [#allocation6 + $0x1], 0  ;;  %s3334_s21 = smov 0   ;;  %s3336_s22 = smov 0  }
   0x7   :  { %s3338_s23 = smov 0   ;;  %s3340_s24 = smov 0  }
   0x8 LB: > { %s3274_s25 = smov [#allocation7]   ;;  %s3355_s27 = sadd.s32 4294967295, %s3272_s24   ;;  %s3272_s24 = sphi %s3340_s24, %s4639_s24   ;;  %s3268_s23 = sphi %s3338_s23, %s4638_s23   ;;  %s3264_s22 = sphi %s3336_s22, %s4637_s22   ;;  %s3260_s21 = sphi %s3334_s21, %s4636_s21  }
   0x9   : > { %s199_s26 = sshll.u32 %s3274_s25, 4  ;;  %p2638_p0 = scmp.ge.s32.totalorder %s3272_s24, 1  ;;  %s3360_s26 = int_to_ptr.vmem [resolvable:$true] %s199_s26 }
   0xa   : > { %p4593_p1 = scmp.eq.s32.totalorder %s3355_s27, 0  ;;  %p187_p2 = scmp.lt.s32.totalorder %s3272_s24, 3 }
   0xb   : > { %s3275_s29 = smov [#allocation10]   ;;  %s3276_s8 = smov [#allocation9]  }
   0xc   : > { %p3362_p3 = pnand %p2638_p0, %p187_p2  ;;  %s225_s30 = sshll.u32 %s3275_s29, 4  ;;  %s3375_s30 = int_to_ptr.vmem [resolvable:$true] %s225_s30 }
   0xd   : > { %s3377_s9 = sshll.u32 %s3276_s8, 4  ;;  %s3024_s12 = scalar_lea.hbm %s4587_s1, 1024  ;;  %s213_s9 = int_to_ptr.vmem [resolvable:$true] %s3377_s9 }
   0xe   : > { %s4603_s28 = scalar_select %p3362_p3, 1, 0 }
   0xf   : > { %p2885_p5 = pneg %p3362_p3  ;;  %p3025_p7 = scmp.ne.s32.totalorder %s4587_s1, %s3024_s12 }
  0x10   : > { %p3031_p11 = scmp.lt.u32.totalorder %s3024_s12, %s4587_s1 }
  0x11   : > { %p3371_p6 = pnand %p2885_p5, %p4593_p1 }
  0x13   : > { %p3387_p8 = pneg %p3371_p6 }
  0x15   : > { %p3027_p9 = pnand %p3387_p8, %p3025_p7 }
  0x17   : > { %p3028_p10 = pneg %p3027_p9 }
  0x19   : > { %p3033_p12 = pnand %p3031_p11, %p3028_p10 }
  0x1b   : > { %3036 = shalt.err (!%p3033_p12)
}
  0x1c   : > { %s3037_s18 = scalar_lea.vmem %s3360_s26, 1024  ;;  %p3045_p5 = scmp.lt.s32.totalorder %s3360_s26, %s3360_s26 }
  0x1d   : > { %p3038_p13 = scmp.ne.s32.totalorder %s3360_s26, %s3037_s18  ;;  %p3046_p4 = scmp.lt.s32.totalorder %s3037_s18, %s3037_s18 }
  0x1f   : > { %p3040_p0 = pnand %p3038_p13, %p3387_p8  ;;  %p3047_p7 = por %p3046_p4, %p3045_p5 }
  0x21   : > { %p3041_p2 = pneg %p3040_p0 }
  0x23   : > { %p3048_p9 = pnand %p3047_p7, %p3041_p2 }
  0x25   : > { %3051 = shalt.err (!%p3048_p9)
}
  0x26   : > { %s3277_s19 = smov 128   ;;  %s3278_s20 = smov 8  }
  0x27   : > { %2888 = dma.hbm_to_vmem [thread:$0]  (!%p3371_p6), %s4587_s1, 1024, %s3360_s26, [#allocation8], %s3277_s19, %s3277_s19, %s3278_s20  }
  0x28   : > { %s3052_s11 = scalar_lea.hbm %s4589_s3, 2560 }
  0x29   : > { %p3053_p4 = scmp.ne.s32.totalorder %s4589_s3, %s3052_s11  ;;  %p3059_p12 = scmp.lt.u32.totalorder %s3052_s11, %s4589_s3 }
  0x2b   : > { %p3055_p10 = pnand %p3053_p4, %p3387_p8 }
  0x2d   : > { %p3056_p11 = pneg %p3055_p10 }
  0x2f   : > { %p3061_p13 = pnand %p3059_p12, %p3056_p11 }
  0x31   : > { %3064 = shalt.err (!%p3061_p13)
}
  0x32   : > { %s3065_s26 = scalar_lea.vmem %s3375_s30, 2560  ;;  %p3073_p7 = scmp.lt.s32.totalorder %s3375_s30, %s3375_s30 }
  0x33   : > { %p3066_p0 = scmp.ne.s32.totalorder %s3375_s30, %s3065_s26  ;;  %p3074_p9 = scmp.lt.s32.totalorder %s3065_s26, %s3065_s26 }
  0x35   : > { %p3068_p2 = pnand %p3066_p0, %p3387_p8  ;;  %p3075_p4 = por %p3074_p9, %p3073_p7 }
  0x37   : > { %p3069_p5 = pneg %p3068_p2 }
  0x39   : > { %p3076_p10 = pnand %p3075_p4, %p3069_p5 }
  0x3b   : > { %3079 = shalt.err (!%p3076_p10)
}
  0x3c   : > { %s3279_s17 = smov 320   ;;  %s3280_s18 = smov 20  }
  0x3d   : > { %2894 = dma.hbm_to_vmem [thread:$0]  (!%p3371_p6), %s4589_s3, 2560, %s3375_s30, [#allocation11], %s3279_s17, %s3279_s17, %s3280_s18  }
  0x3e   : > { %s3080_s11 = scalar_lea.hbm %s4588_s2, 1024 }
  0x3f   : > { %p3081_p11 = scmp.ne.s32.totalorder %s4588_s2, %s3080_s11  ;;  %p3087_p0 = scmp.lt.u32.totalorder %s3080_s11, %s4588_s2 }
  0x41   : > { %p3083_p12 = pnand %p3081_p11, %p3387_p8 }
  0x43   : > { %p3084_p13 = pneg %p3083_p12 }
  0x45   : > { %p3089_p2 = pnand %p3087_p0, %p3084_p13 }
  0x47   : > { %3092 = shalt.err (!%p3089_p2)
}
  0x48   : > { %s3093_s26 = scalar_lea.vmem %s213_s9, 1024  ;;  %p3101_p4 = scmp.lt.s32.totalorder %s213_s9, %s213_s9 }
  0x49   : > { %p3094_p5 = scmp.ne.s32.totalorder %s213_s9, %s3093_s26  ;;  %p3102_p10 = scmp.lt.s32.totalorder %s3093_s26, %s3093_s26 }
  0x4b   : > { %p3096_p7 = pnand %p3094_p5, %p3387_p8  ;;  %p3103_p1 = por %p3102_p10, %p3101_p4 }
  0x4d   : > { %p3097_p9 = pneg %p3096_p7 }
  0x4f   : > { %p3104_p3 = pnand %p3103_p1, %p3097_p9 }
  0x51   : > { %3107 = shalt.err (!%p3104_p3)
}
  0x52   : > { %2891 = dma.hbm_to_vmem [thread:$0]  (!%p3371_p6), %s4588_s2, 1024, %s213_s9, [#allocation8], %s3277_s19, %s3277_s19, %s3278_s20  }
  0x53   : > { %s3281_s18 = smov [#allocation12]   ;;  %s3282_s29 = smov [#allocation13]  }
  0x54   : > { %s238_s25 = sshll.u32 %s3281_s18, 4  ;;  %s252_s8 = sshll.u32 %s3282_s29, 4  ;;  %s239_s25 = int_to_ptr.vmem [resolvable:$true] %s238_s25  ;;  %s253_s8 = int_to_ptr.vmem [resolvable:$true] %s252_s8 }
  0x55   : > { %s3108_s12 = scalar_lea.hbm %s4590_s4, 1024 }
  0x56   : > { %p3109_p1 = scmp.ne.s32.totalorder %s4590_s4, %s3108_s12  ;;  %p3115_p12 = scmp.lt.u32.totalorder %s3108_s12, %s4590_s4 }
  0x58   : > { %p3111_p3 = pnand %p3109_p1, %p3387_p8 }
  0x5a   : > { %p3112_p11 = pneg %p3111_p3 }
  0x5c   : > { %p3117_p13 = pnand %p3115_p12, %p3112_p11 }
  0x5e   : > { %3120 = shalt.err (!%p3117_p13)
}
  0x5f   : > { %s3121_s9 = scalar_lea.vmem %s239_s25, 1024  ;;  %p3129_p7 = scmp.lt.s32.totalorder %s239_s25, %s239_s25 }
  0x60   : > { %p3122_p0 = scmp.ne.s32.totalorder %s239_s25, %s3121_s9  ;;  %p3130_p9 = scmp.lt.s32.totalorder %s3121_s9, %s3121_s9 }
  0x62   : > { %p3124_p2 = pnand %p3122_p0, %p3387_p8  ;;  %p3131_p4 = por %p3130_p9, %p3129_p7 }
  0x64   : > { %p3125_p5 = pneg %p3124_p2 }
  0x66   : > { %p3132_p10 = pnand %p3131_p4, %p3125_p5 }
  0x68   : > { %3135 = shalt.err (!%p3132_p10)
}
  0x69   : > { %2897 = dma.hbm_to_vmem [thread:$0]  (!%p3371_p6), %s4590_s4, 1024, %s239_s25, [#allocation11], %s3277_s19, %s3277_s19, %s3278_s20  }
  0x6a   : > { %s3136_s10 = scalar_lea.hbm %s4591_s5, 48 }
  0x6b   : > { %p3137_p1 = scmp.ne.s32.totalorder %s4591_s5, %s3136_s10  ;;  %p3143_p12 = scmp.lt.u32.totalorder %s3136_s10, %s4591_s5 }
  0x6d   : > { %p3139_p3 = pnand %p3137_p1, %p3387_p8 }
  0x6f   : > { %p3140_p11 = pneg %p3139_p3 }
  0x71   : > { %p3145_p13 = pnand %p3143_p12, %p3140_p11 }
  0x73   : > { %3148 = shalt.err (!%p3145_p13)
}
  0x74   : > { %s3149_s16 = scalar_lea.vmem %s253_s8, 48  ;;  %s3156_s19 = scalar_lea.vmem %s253_s8, 64 }
  0x75   : > { %p3150_p0 = scmp.ne.s32.totalorder %s253_s8, %s3149_s16  ;;  %p3157_p7 = scmp.lt.s32.totalorder %s253_s8, %s253_s8 }
  0x76   : > { %p3158_p9 = scmp.lt.s32.totalorder %s3156_s19, %s3149_s16 }
  0x77   : > { %p3152_p2 = pnand %p3150_p0, %p3387_p8 }
  0x78   : > { %p3159_p4 = por %p3158_p9, %p3157_p7 }
  0x79   : > { %p3153_p5 = pneg %p3152_p2 }
  0x7b   : > { %p3160_p10 = pnand %p3159_p4, %p3153_p5 }
  0x7d   : > { %3163 = shalt.err (!%p3160_p10)
}
  0x7e   : > { %2900 = dma.hbm_to_vmem [thread:$0]  (!%p3371_p6), %s4591_s5, 48, %s253_s8, [#allocation14]  }
  0x7f   : > { %s2637_s15 = sadd.s32 4294967294, %s3272_s24   ;;  %s3497_s7 = sadd.s32 1, %s3272_s24  }
  0x80   : > { %s32_s26 = sadd.s32 1, %s3268_s23  ;;  %s29_s9 = ssub.s32 %s3272_s24, %s3497_s7 }
  0x81   : > { %p39_p8 = scmp.ne.s32.totalorder %s3268_s23, %s3264_s22  ;;  %p30_p1 = scmp.eq.s32.totalorder %s29_s9, 0 }
  0x82   : > { %p40_p3 = scmp.eq.s32.totalorder %s3272_s24, 0  ;;  %p45_p11 = scmp.ne.s32.totalorder %s3264_s22, %s3260_s21 }
  0x83   : > { %p174_p12 = scmp.eq.s32.totalorder %s3355_s27, 1  ;;  %p4606_p0 = scmp.eq.s32.totalorder %s3355_s27, 0 }
  0x84   : > { %s3509_s30 = scalar_select %p30_p1, %s3268_s23, %s32_s26  }
  0x85   : > { %p41_p13 = por %p40_p3, %p39_p8  ;;  %p3513_p2 = por %p4606_p0, %p45_p11 }
  0x86   : > { %p3517_p6 = por %p174_p12, %p39_p8  ;;  %p180_p5 = scmp.eq.s32.totalorder %s2637_s15, 1 }
  0x87   : > { %p2914_p7 = scmp.lt.s32.totalorder %s3272_s24, 2  ;;  %s263_s18 = sand.u32 1, %s3268_s23  }
  0x88   : > { %s4608_s8 = scalar_select %p3517_p6, 1, 0 }
  0x89   : > { %p3523_p9 = por %p180_p5, %p45_p11  ;;  %s2645_s10 = sshll.u32 %s263_s18, 5 }
  0x8a   : > { %s2706_s11 = sshll.u32 %s3272_s24, 9  ;;  %s267_s16 = scalar_lea.vmem [#allocation4], %s2645_s10 }
  0x8b   : > { %s4609_s29 = scalar_select %p3523_p9, 1, 0 }
  0x8c   : > { %s3531_s14 = scalar_lea.hbm %s4586_s0, %s2706_s11  ;;  %s274_s19 = sshll.u32 %s267_s16, 4  ;;  %s3537_s19 = int_to_ptr.vmem [resolvable:$true] %s274_s19 }
  0x8d   : > { %p3533_p4 = pnand %p2914_p7, %p41_p13  ;;  %s3539_s25 = scalar_lea.sflag [#allocation5], %s263_s18 }
  0x8e   : > { %s3164_s15 = scalar_lea.hbm %s3531_s14, 512  ;;  %s3169_s10 = scalar_lea.hbm %s4586_s0, 1024 }
  0x8f   : > { %p3165_p10 = scmp.ne.s32.totalorder %s3531_s14, %s3164_s15  ;;  %p3166_p8 = pneg %p3533_p4 }
  0x90   : > { %p3170_p11 = scmp.lt.u32.totalorder %s3531_s14, %s4586_s0  ;;  %p3171_p12 = scmp.lt.u32.totalorder %s3169_s10, %s3164_s15 }
  0x91   : > { %p3167_p1 = pnand %p3166_p8, %p3165_p10  ;;  %p3173_p0 = scmp.lt.u32.totalorder %s3164_s15, %s3531_s14 }
  0x92   : > { %p3172_p13 = por %p3171_p12, %p3170_p11 }
  0x93   : > { %p3168_p3 = pneg %p3167_p1 }
  0x94   : > { %p3174_p5 = por %p3173_p0, %p3172_p13 }
  0x96   : > { %p3175_p7 = pnand %p3174_p5, %p3168_p3 }
  0x98   : > { %3178 = shalt.err (!%p3175_p7)
}
  0x99   : > { %s3179_s18 = scalar_lea.vmem %s3537_s19, 512  ;;  %s3283_s13 = smov [#allocation4]  }
  0x9a   : > { %p3180_p10 = scmp.ne.s32.totalorder %s3537_s19, %s3179_s18  ;;  %s3184_s16 = sshll.u32 %s3283_s13, 4  ;;  %s3185_s16 = int_to_ptr.vmem [resolvable:$false] %s3184_s16 }
  0x9b   : > { %s3186_s26 = scalar_lea.vmem %s3185_s16, 1024  ;;  %p3187_p6 = scmp.lt.s32.totalorder %s3537_s19, %s3185_s16 }
  0x9c   : > { %p3182_p1 = pnand %p3180_p10, %p3166_p8  ;;  %p3188_p11 = scmp.lt.s32.totalorder %s3186_s26, %s3179_s18 }
  0x9e   : > { %p3183_p9 = pneg %p3182_p1  ;;  %p3189_p12 = por %p3188_p11, %p3187_p6 }
  0xa0   : > { %p3190_p13 = pnand %p3189_p12, %p3183_p9 }
  0xa2   : > { %3193 = shalt.err (!%p3190_p13)
}
  0xa3   : > { %s3284_s15 = smov 256   ;;  %s3285_s9 = smov 16  }
  0xa4   : > { %2904 = dma.hbm_to_vmem [thread:$0]  (!%p3533_p4), %s3531_s14, 512, %s3537_s19, %s3539_s25, %s3284_s15, %s3284_s15, %s3285_s9  }
  0xa5   : > { %p4611_p8 = scmp.ne.s32.totalorder %s4603_s28, 0 }
  0xa7   : > { %286 = sbr.rel (%p4611_p8) target bundleno = 1319 (0x527), region = 44 }
  0xae   : > { %s3570_s10 = sand.u32 1, %s3264_s22  }
  0xaf   : > { %s2649_s11 = sshll.u32 %s3570_s10, 5  ;;  %s289_s12 = scalar_lea.sflag [#allocation5], %s3570_s10 }
  0xb0   : > { %s3574_s18 = scalar_lea.vmem [#allocation4], %s2649_s11 }
  0xb1   : > { %3239 = dma.done.wait (%p3513_p2), %s289_s12, 512  }
  0xb2   : > { %3241 = vsyncadd (%p3513_p2), %s289_s12, 4294966784  ;;  %p4612_p6 = scmp.eq.s32.totalorder %s3355_s27, 0 }
  0xb4   : > { %3243 = dma.done.wait (%p4612_p6), [#allocation8], 2048   ;;  %p4613_p9 = pmov %p4612_p6 }
  0xb5   : > { %p4614_p4 = pmov %p4612_p6 }
  0xb6   : > { %3245 = vsyncadd (%p4613_p9), [#allocation8], 4294965248 }
  0xb7   : > { %3247 = dma.done.wait (%p4614_p4), [#allocation11], 3584   ;;  %p4615_p3 = pmov %p4614_p4 }
  0xb9   : > { %3249 = vsyncadd (%p4615_p3), [#allocation11], 4294963712  ;;  %p4616_p0 = pmov %p4615_p3 }
  0xbb   : > { %3251 = dma.done.wait (%p4616_p0), [#allocation14], 48   ;;  %p4617_p5 = pmov %p4616_p0 }
  0xbc   : > { %v2978_v0 = vld [vmem:[%s3574_s18 + $0x4] ss:$16 sps:$4 sm:$0xff]   ;;  %v2980_v1 = vld [vmem:[%s3574_s18] ss:$16 sps:$4 sm:$0xff]   ;;  %s3286_s28 = smov 127   ;;  %s3287_s17 = smov 126  }
  0xbd   : > { %3253 = vsyncadd (%p4617_p5), [#allocation14], 4294967248  ;;  %370 = vrot.lane.b32.xlu0 %v2978_v0, %s3286_s28  ;;  %v3596_v2 = vld [vmem:[%s3574_s18 + $0x8] ss:$16 sps:$4 sm:$0xff]   ;;  %644 = vmatprep.subr.bf16.mxu1 %v2978_v0  ;;  %s3288_s14 = smov 110   ;;  %s3289_s19 = smov 109  }
  0xbe   : > { %368 = vrot.lane.b32.xlu1 %v2980_v1, %s3286_s28  ;;  %645 = vmatpush1.bf16.msra.mxu1 %v2980_v1  ;;  %s3290_s20 = smov 108   ;;  %s3291_s25 = smov 92   ;;  %v3621_v3 = vld [vmem:[#allocation7 + $0x4] ss:$8 sps:$4 sm:$0xff]   ;;  %vm631_vm0 = vcmask 130048   ;;  %v4596_v4 = vmov 0  }
  0xbf   : > { %s3292_s13 = smov 91   ;;  %2667 = vmatprep.mubr.msk.bf16.mxu1 %vm631_vm0, %v3621_v3  ;;  %2976 = vset.pattern.permute.xlu0 %v4596_v4  ;;  %s3294_s16 = smov 90   ;;  %v2983_v5 = vld [vmem:[%s3574_s18 + $0xc] ss:$16 sps:$4 sm:$0xff]   ;;  %v547_v6 = vld [vmem:[#allocation9] sm:$0xff]  ;;  %v549_v9 = vld [vmem:[#allocation9 + $0x10] sm:$0xff] }
  0xc0   : > { %2977 = vset.pattern.permute.xlu1 %v4596_v4  ;;  %v548_v7 = vld [vmem:[#allocation9 + $0x8] sm:$0xff]  ;;  %v550_v8 = vld [vmem:[#allocation9 + $0x18] sm:$0xff]  ;;  %v551_v11 = vld [vmem:[#allocation9 + $0x20] sm:$0xff]  ;;  %vm376_vm1 = vcmask 1039360   ;;  %vm394_vm2 = vcmask 1031168   ;;  %vm412_vm3 = vcmask 900096  }
  0xc1   : > { %372 = vrot.lane.b32.xlu0 %v3596_v2, %s3286_s28  ;;  %v552_v10 = vld [vmem:[#allocation9 + $0x28] sm:$0xff]  ;;  %v554_v12 = vld [vmem:[#allocation9 + $0x38] sm:$0xff]  ;;  %v553_v13 = vld [vmem:[#allocation9 + $0x30] sm:$0xff]  ;;  %vm430_vm4 = vcmask 891904   ;;  %vm448_vm5 = vcmask 883712   ;;  %vm466_vm6 = vcmask 752640  }
  0xc2   : > { %388 = vrot.lane.b32.xlu1 %v2978_v0, %s3287_s17  ;;  %vm484_vm7 = vcmask 744448   ;;  %vm502_vm8 = vcmask 736256   ;;  %v2984_v54 = vld [vmem:[#allocation7] ss:$8 sps:$4 sm:$0xff]   ;;  %v2987_v55 = vld [vmem:[#allocation7 + $0x14] ss:$8 sps:$4 sm:$0xff]  }
  0xc3   : > { %v2989_v58 = vld [vmem:[#allocation7 + $0x10] ss:$8 sps:$4 sm:$0xff]   ;;  %v2990_v60 = vld [vmem:[#allocation7 + $0x24] ss:$8 sps:$4 sm:$0xff]   ;;  %vm847_vm9 = vcmask 154624   ;;  %s3295_s26 = smov 19  }
  0xc4   : > { %848 = vst.msk [vmem:[#allocation3] sm:$0xff] %vm847_vm9, %v4596_v4  ;;  %849 = vst.msk [vmem:[#allocation3 + $0x20] sm:$0xff] %vm847_vm9, %v4596_v4  ;;  %vm852_vm10 = vcmask 310424   ;;  %vm930_vm11 = vcmask 1047704   ;;  %vm2051_vm12 = vcmask 523264   ;;  %s2859_s15 = smul.u32 192, %s3570_s10 }
  0xc5   : > { %390 = vrot.lane.b32.xlu0 %v3596_v2, %s3287_s17  ;;  %850 = vst.msk [vmem:[#allocation3 + $0x40] sm:$0xff] %vm847_vm9, %v4596_v4  ;;  %851 = vst.msk [vmem:[#allocation3 + $0x60] sm:$0xff] %vm847_vm9, %v4596_v4  ;;  %s2860_s11 = smul.u32 3072, %s3355_s27  ;;  %p4633_p7 = scmp.ne.s32.totalorder %s4608_s8, 0 }
  0xc6   : > { %386 = vrot.lane.b32.xlu1 %v2980_v1, %s3287_s17  ;;  %853 = vst.msk [vmem:[#allocation3 + $0x18] sm:$0xff] %vm852_vm10, %v4596_v4  ;;  %854 = vst.msk [vmem:[#allocation3 + $0x38] sm:$0xff] %vm852_vm10, %v4596_v4  ;;  %s4499_s9 = scalar_lea.vmem [#allocation15], %s2859_s15 }
  0xc7   : > { %855 = vst.msk [vmem:[#allocation3 + $0x58] sm:$0xff] %vm852_vm10, %v4596_v4  ;;  %856 = vst.msk [vmem:[#allocation3 + $0x78] sm:$0xff] %vm852_vm10, %v4596_v4  ;;  %s2516_s12 = sshll.u32 %s4499_s9, 4  ;;  %s4536_s12 = int_to_ptr.vmem [resolvable:$true] %s2516_s12 }
  0xc9   : > { %406 = vrot.lane.b32.xlu0 %v2978_v0, %s3288_s14 }
  0xca   : > { %408 = vrot.lane.b32.xlu1 %v3596_v2, %s3288_s14 }
  0xcd   : > { %404 = vrot.lane.b32.xlu0 %v2980_v1, %s3288_s14 }
  0xce   : > { %424 = vrot.lane.b32.xlu1 %v2978_v0, %s3289_s19 }
  0xd1   : > { %426 = vrot.lane.b32.xlu0 %v3596_v2, %s3289_s19 }
  0xd2   : > { %422 = vrot.lane.b32.xlu1 %v2980_v1, %s3289_s19 }
  0xd5   : > { %442 = vrot.lane.b32.xlu0 %v2978_v0, %s3290_s20 }
  0xd6   : > { %444 = vrot.lane.b32.xlu1 %v3596_v2, %s3290_s20 }
  0xd9   : > { %440 = vrot.lane.b32.xlu0 %v2980_v1, %s3290_s20 }
  0xda   : > { %460 = vrot.lane.b32.xlu1 %v2978_v0, %s3291_s25 }
  0xdd   : > { %462 = vrot.lane.b32.xlu0 %v3596_v2, %s3291_s25 }
  0xde   : > { %458 = vrot.lane.b32.xlu1 %v2980_v1, %s3291_s25 }
  0xe1   : > { %478 = vrot.lane.b32.xlu0 %v2978_v0, %s3292_s13 }
  0xe2   : > { %480 = vrot.lane.b32.xlu1 %v3596_v2, %s3292_s13 }
  0xe5   : > { %476 = vrot.lane.b32.xlu0 %v2980_v1, %s3292_s13 }
  0xe6   : > { %496 = vrot.lane.b32.xlu1 %v2978_v0, %s3294_s16  ;;  %v2992_v0 = vld [vmem:[#allocation7 + $0x20] ss:$8 sps:$4 sm:$0xff]  }
  0xe9   : > { %498 = vrot.lane.b32.xlu0 %v3596_v2, %s3294_s16 }
  0xea   : > { %494 = vrot.lane.b32.xlu1 %v2980_v1, %s3294_s16 }
  0xed   : > { %374 = vrot.lane.b32.xlu0 %v2983_v5, %s3286_s28 }
  0xee   : > { %392 = vrot.lane.b32.xlu1 %v2983_v5, %s3287_s17 }
  0xf1   : > { %410 = vrot.lane.b32.xlu0 %v2983_v5, %s3288_s14 }
  0xf2   : > { %428 = vrot.lane.b32.xlu1 %v2983_v5, %s3289_s19 }
  0xf5   : > { %446 = vrot.lane.b32.xlu0 %v2983_v5, %s3290_s20 }
  0xf6   : > { %464 = vrot.lane.b32.xlu1 %v2983_v5, %s3291_s25 }
  0xf9   : > { %482 = vrot.lane.b32.xlu0 %v2983_v5, %s3292_s13 }
  0xfa   : > { %500 = vrot.lane.b32.xlu1 %v2983_v5, %s3294_s16 }
  0xfd   : > { %557 = vperm.xlu0 %2976, %v547_v6  }
  0xfe   : > { %562 = vperm.xlu1 %2977, %v548_v7  }
 0x101   : > { %572 = vperm.xlu0 %2976, %v550_v8   ;;  %v2995_v8 = vld [vmem:[#allocation7 + $0x30] ss:$8 sps:$4 sm:$0xff]  }
 0x102   : > { %567 = vperm.xlu1 %2977, %v549_v9  }
 0x105   : > { %582 = vperm.xlu0 %2976, %v552_v10  }
 0x106   : > { %577 = vperm.xlu1 %2977, %v551_v11  }
 0x109   : > { %592 = vperm.xlu0 %2976, %v554_v12  }
 0x10a   : > { %587 = vperm.xlu1 %2977, %v553_v13  }
 0x12f   : > { %v371_v14 = vpop.permute.xlu0 %370 }
 0x130   : > { %v369_v15 = vpop.permute.xlu1 %368 }
 0x131   : > { %v377_v19 = vsel %vm376_vm1, %v369_v15, %v371_v14 }
 0x133   : > { %v3644_v16 = vpop.permute.xlu0 %372 }
 0x134   : > { %v389_v17 = vpop.permute.xlu1 %388  ;;  %v378_v18 = vsel %vm376_vm1, %v371_v14, %v3644_v16 }
 0x135   : > { %646 = vmatprep.subr.bf16.mxu1 %v378_v18 }
 0x136   : > { %647 = vmatpush1.bf16.msra.mxu1 %v377_v19  ;;  %v3719_v19 = vld [vmem:[#allocation13] sm:$0x7] }
 0x137   : > { %v3649_v20 = vpop.permute.xlu0 %390 }
 0x138   : > { %v387_v21 = vpop.permute.xlu1 %386  ;;  %v396_v22 = vsel %vm394_vm2, %v389_v17, %v3649_v20 }
 0x139   : > { %648 = vmatprep.subr.bf16.mxu1 %v396_v22  ;;  %v395_v23 = vsel %vm394_vm2, %v387_v21, %v389_v17 }
 0x13a   : > { %649 = vmatpush1.bf16.msra.mxu1 %v395_v23 }
 0x13b   : > { %v407_v24 = vpop.permute.xlu0 %406 }
 0x13c   : > { %v3654_v25 = vpop.permute.xlu1 %408 }
 0x13d   : > { %v414_v26 = vsel %vm412_vm3, %v407_v24, %v3654_v25 }
 0x13e   : > { %650 = vmatprep.subr.bf16.mxu1 %v414_v26 }
 0x13f   : > { %v405_v27 = vpop.permute.xlu0 %404 }
 0x140   : > { %v425_v28 = vpop.permute.xlu1 %424  ;;  %v413_v29 = vsel %vm412_vm3, %v405_v27, %v407_v24 }
 0x141   : > { %651 = vmatpush1.bf16.msra.mxu1 %v413_v29 }
 0x143   : > { %v3659_v30 = vpop.permute.xlu0 %426 }
 0x144   : > { %v423_v31 = vpop.permute.xlu1 %422  ;;  %v432_v32 = vsel %vm430_vm4, %v425_v28, %v3659_v30 }
 0x145   : > { %652 = vmatprep.subr.bf16.mxu1 %v432_v32  ;;  %v431_v33 = vsel %vm430_vm4, %v423_v31, %v425_v28 }
 0x146   : > { %653 = vmatpush1.bf16.msra.mxu1 %v431_v33 }
 0x147   : > { %v443_v34 = vpop.permute.xlu0 %442 }
 0x148   : > { %v3664_v35 = vpop.permute.xlu1 %444 }
 0x149   : > { %v450_v36 = vsel %vm448_vm5, %v443_v34, %v3664_v35 }
 0x14a   : > { %654 = vmatprep.subr.bf16.mxu1 %v450_v36 }
 0x14b   : > { %v441_v37 = vpop.permute.xlu0 %440 }
 0x14c   : > { %v461_v38 = vpop.permute.xlu1 %460  ;;  %v449_v39 = vsel %vm448_vm5, %v441_v37, %v443_v34 }
 0x14d   : > { %655 = vmatpush1.bf16.msra.mxu1 %v449_v39 }
 0x14f   : > { %v463_v40 = vpop.permute.xlu0 %462 }
 0x150   : > { %v459_v41 = vpop.permute.xlu1 %458  ;;  %v468_v42 = vsel %vm466_vm6, %v461_v38, %v463_v40 }
 0x151   : > { %656 = vmatprep.subr.bf16.mxu1 %v468_v42  ;;  %v467_v43 = vsel %vm466_vm6, %v459_v41, %v461_v38 }
 0x152   : > { %657 = vmatpush1.bf16.msra.mxu1 %v467_v43 }
 0x153   : > { %v479_v44 = vpop.permute.xlu0 %478 }
 0x154   : > { %v481_v45 = vpop.permute.xlu1 %480 }
 0x155   : > { %v486_v46 = vsel %vm484_vm7, %v479_v44, %v481_v45 }
 0x156   : > { %658 = vmatprep.subr.bf16.mxu1 %v486_v46 }
 0x157   : > { %v477_v47 = vpop.permute.xlu0 %476 }
 0x158   : > { %v497_v48 = vpop.permute.xlu1 %496  ;;  %v485_v49 = vsel %vm484_vm7, %v477_v47, %v479_v44 }
 0x159   : > { %659 = vmatpush1.bf16.msra.mxu1 %v485_v49 }
 0x15b   : > { %v499_v50 = vpop.permute.xlu0 %498 }
 0x15c   : > { %v495_v51 = vpop.permute.xlu1 %494  ;;  %v504_v52 = vsel %vm502_vm8, %v497_v48, %v499_v50 }
 0x15d   : > { %660 = vmatprep.subr.bf16.mxu1 %v504_v52  ;;  %v503_v53 = vsel %vm502_vm8, %v495_v51, %v497_v48 }
 0x15e   : > { %661 = vmatpush1.bf16.msra.mxu1 %v503_v53 }
 0x15f   : > { %717 = vmatprep.subr.bf16.mxu1 %v4596_v4  ;;  %v375_v56 = vpop.permute.xlu0 %374 }
 0x160   : > { %v379_v57 = vsel %vm376_vm1, %v3644_v16, %v375_v56  ;;  %v393_v59 = vpop.permute.xlu1 %392 }
 0x161   : > { %677 = vmatmul.mubr.bf16.vlgmr.msra.gmra.mrb[0].mxu1 %v2984_v54  ;;  %v397_v61 = vsel %vm394_vm2, %v3649_v20, %v393_v59 }
 0x162   : > { %718 = vmatpush1.bf16.msra.mxu1 %v3596_v2  ;;  %2668 = vmatprep.mubr.msk.bf16.mxu1 %vm631_vm0, %v2987_v55  ;;  %v2993_v2 = vld [vmem:[#allocation7 + $0x34] ss:$8 sps:$4 sm:$0xff]  }
 0x163   : > { %719 = vmatprep.subr.bf16.mxu1 %v4596_v4  ;;  %v411_v62 = vpop.permute.xlu0 %410 }
 0x164   : > { %v415_v63 = vsel %vm412_vm3, %v3654_v25, %v411_v62  ;;  %v429_v1 = vpop.permute.xlu1 %428 }
 0x165   : > { %v433_v5 = vsel %vm430_vm4, %v3659_v30, %v429_v1 }
 0x166   : > { %720 = vmatpush1.bf16.msra.mxu1 %v379_v57 }
 0x167   : > { %721 = vmatprep.subr.bf16.mxu1 %v4596_v4  ;;  %v447_v6 = vpop.permute.xlu0 %446 }
 0x168   : > { %v451_v7 = vsel %vm448_vm5, %v3664_v35, %v447_v6  ;;  %v465_v9 = vpop.permute.xlu1 %464 }
 0x169   : > { %687 = vmatmul.mubr.bf16.gmra.mrb[4].mxu1 %v2989_v58  ;;  %v469_v10 = vsel %vm466_vm6, %v463_v40, %v465_v9 }
 0x16a   : > { %722 = vmatpush1.bf16.msra.mxu1 %v397_v61  ;;  %2669 = vmatprep.mubr.msk.bf16.mxu1 %vm631_vm0, %v2990_v60 }
 0x16b   : > { %723 = vmatprep.subr.bf16.mxu1 %v4596_v4  ;;  %v483_v11 = vpop.permute.xlu0 %482 }
 0x16c   : > { %v487_v12 = vsel %vm484_vm7, %v481_v45, %v483_v11  ;;  %v501_v13 = vpop.permute.xlu1 %500 }
 0x16d   : > { %v505_v14 = vsel %vm502_vm8, %v499_v50, %v501_v13 }
 0x16e   : > { %724 = vmatpush1.bf16.msra.mxu1 %v415_v63 }
 0x16f   : > { %725 = vmatprep.subr.bf16.mxu1 %v4596_v4 }
 0x171   : > { %697 = vmatmul.mubr.bf16.gmra.mrb[8].mxu1 %v2992_v0 }
 0x172   : > { %726 = vmatpush1.bf16.msra.mxu1 %v433_v5  ;;  %2670 = vmatprep.mubr.msk.bf16.mxu1 %vm631_vm0, %v2993_v2 }
 0x173   : > { %727 = vmatprep.subr.bf16.mxu1 %v4596_v4 }
 0x176   : > { %728 = vmatpush1.bf16.msra.mxu1 %v451_v7 }
 0x177   : > { %729 = vmatprep.subr.bf16.mxu1 %v4596_v4 }
 0x179   : > { %707 = vmatmul.mubr.bf16.gmra.mrb[12].mxu1 %v2995_v8 }
 0x17a   : > { %730 = vmatpush1.bf16.msra.mxu1 %v469_v10  ;;  %2671 = vmatprep.mubr.msk.bf16.mxu1 %vm631_vm0, %v3621_v3  ;;  %v808_v3 = vlaneseq }
 0x17b   : > { %731 = vmatprep.subr.bf16.mxu1 %v4596_v4 }
 0x17c   : > { %v3714_v15 = vshrl.u32 %v808_v3, 7  ;;  %v3717_v17 = vpop.permute.xlu0 %557 }
 0x17d   : > { %v3723_v23 = vpop.permute.xlu1 %562 }
 0x17e   : > { %732 = vmatpush1.bf16.msra.mxu1 %v487_v12  ;;  %v810_v16 = vsub.s32 0, %v3714_v15  ;;  %v814_v20 = vsub.s32 1, %v3714_v15 }
 0x17f   : > { %733 = vmatprep.subr.bf16.mxu1 %v4596_v4 }
 0x180   : > { %v3727_v27 = vrot.slane %v3719_v19, %v810_v16  ;;  %v3731_v31 = vrot.slane %v3719_v19, %v814_v20  ;;  %v3741_v44 = vpop.permute.xlu0 %572 }
 0x181   : > { %v3736_v37 = vpop.permute.xlu1 %567 }
 0x182   : > { %734 = vmatpush1.bf16.msra.mxu1 %v505_v14 }
 0x185   : > { %750 = vmatmul.mubr.bf16.vlgmr.msra.gmra.mrb[16].mxu1 %v2984_v54  ;;  %v3750_v57 = vpop.permute.xlu1 %577 }
 0x186   : > { %2672 = vmatprep.mubr.msk.bf16.mxu1 %vm631_vm0, %v2987_v55 }
 0x189   : > { %v3764_v3 = vpop.permute.xlu1 %587 }
 0x18d   : > { %758 = vmatmul.mubr.bf16.gmra.mrb[20].mxu1 %v2989_v58 }
 0x18e   : > { %2673 = vmatprep.mubr.msk.bf16.mxu1 %vm631_vm0, %v2990_v60 }
 0x195   : > { %766 = vmatmul.mubr.bf16.gmra.mrb[24].mxu1 %v2992_v0  ;;  %v3755_v0 = vpop.permute.xlu0 %582 }
 0x196   : > { %2674 = vmatprep.mubr.msk.bf16.mxu1 %vm631_vm0, %v2993_v2 }
 0x19d   : > { %774 = vmatmul.mubr.bf16.gmra.mrb[28].mxu1 %v2995_v8 }
 0x234   : > { %v678_v18 = vpop.f32.mrb[0].mxu1 }
 0x235   : > { %v679_v21 = vadd.f32 %v678_v18, %v3717_v17  ;;  %v680_v22 = vpop.f32.mrb[1].mxu1 }
 0x236   : > { %v681_v24 = vadd.f32 %v680_v22, %v3717_v17  ;;  %v682_v25 = vpop.f32.mrb[2].mxu1 }
 0x237   : > { %v782_v26 = vmax.f32 %v679_v21, 0.0  ;;  %v683_v28 = vadd.f32 %v682_v25, %v3723_v23  ;;  %v684_v29 = vpop.f32.mrb[3].mxu1  ;;  %v3769_v25 = vpop.permute.xlu0 %592 }
 0x238   : > { %v783_v30 = vmax.f32 %v681_v24, 0.0  ;;  %v685_v32 = vadd.f32 %v684_v29, %v3723_v23 }
 0x239   : > { %v785_v33 = vmax.f32 %v683_v28, 0.0  ;;  %v823_v35 = vmul.f32 %v3727_v27, %v782_v26 }
 0x23a   : > { %v786_v34 = vmax.f32 %v685_v32, 0.0  ;;  %v824_v38 = vmul.f32 %v3731_v31, %v783_v30 }
 0x23b   : > { %v826_v36 = vmul.f32 %v3727_v27, %v785_v33 }
 0x23c   : > { %v827_v39 = vmul.f32 %v3731_v31, %v786_v34  ;;  %v688_v40 = vpop.f32.mrb[4].mxu1 }
 0x23d   : > { %v689_v41 = vadd.f32 %v688_v40, %v3736_v37  ;;  %v690_v42 = vpop.f32.mrb[5].mxu1  ;;  %v857_v43 = vpack.c.bf16 %v826_v36, %v823_v35 }
 0x23e   : > { %v691_v45 = vadd.f32 %v690_v42, %v3736_v37  ;;  %v692_v46 = vpop.f32.mrb[6].mxu1  ;;  %v858_v47 = vpack.c.bf16 %v827_v39, %v824_v38 }
 0x23f   : > { %v788_v48 = vmax.f32 %v689_v41, 0.0  ;;  %v693_v49 = vadd.f32 %v692_v46, %v3741_v44  ;;  %v694_v50 = vpop.f32.mrb[7].mxu1  ;;  %881 = vrot.lane.b32.xlu1 %v857_v43, %s3295_s26  ;;  %v818_v46 = vsub.s32 2, %v3714_v15 }
 0x240   : > { %v789_v51 = vmax.f32 %v691_v45, 0.0  ;;  %v695_v52 = vadd.f32 %v694_v50, %v3741_v44  ;;  %883 = vrot.lane.b32.xlu0 %v858_v47, %s3295_s26 }
 0x241   : > { %v791_v53 = vmax.f32 %v693_v49, 0.0  ;;  %v829_v55 = vmul.f32 %v3727_v27, %v788_v48  ;;  %v819_v50 = vrot.slane %v3719_v19, %v818_v46 }
 0x242   : > { %v792_v54 = vmax.f32 %v695_v52, 0.0  ;;  %v830_v58 = vmul.f32 %v3731_v31, %v789_v51 }
 0x243   : > { %v832_v56 = vmul.f32 %v3727_v27, %v791_v53 }
 0x244   : > { %v833_v59 = vmul.f32 %v3731_v31, %v792_v54  ;;  %v698_v60 = vpop.f32.mrb[8].mxu1 }
 0x245   : > { %v699_v61 = vadd.f32 %v698_v60, %v3750_v57  ;;  %v700_v62 = vpop.f32.mrb[9].mxu1  ;;  %v860_v63 = vpack.c.bf16 %v832_v56, %v829_v55 }
 0x246   : > { %v701_v1 = vadd.f32 %v700_v62, %v3750_v57  ;;  %v702_v2 = vpop.f32.mrb[10].mxu1  ;;  %v861_v5 = vpack.c.bf16 %v833_v59, %v830_v58 }
 0x247   : > { %v794_v6 = vmax.f32 %v699_v61, 0.0  ;;  %v703_v7 = vadd.f32 %v702_v2, %v3755_v0  ;;  %v704_v8 = vpop.f32.mrb[11].mxu1  ;;  %887 = vrot.lane.b32.xlu0 %v860_v63, %s3295_s26 }
 0x248   : > { %v795_v9 = vmax.f32 %v701_v1, 0.0  ;;  %v705_v10 = vadd.f32 %v704_v8, %v3755_v0  ;;  %889 = vrot.lane.b32.xlu1 %v861_v5, %s3295_s26 }
 0x249   : > { %v797_v11 = vmax.f32 %v703_v7, 0.0  ;;  %v835_v13 = vmul.f32 %v3727_v27, %v794_v6 }
 0x24a   : > { %v798_v12 = vmax.f32 %v705_v10, 0.0  ;;  %v836_v16 = vmul.f32 %v3731_v31, %v795_v9 }
 0x24b   : > { %v838_v14 = vmul.f32 %v3727_v27, %v797_v11 }
 0x24c   : > { %v839_v18 = vmul.f32 %v3731_v31, %v798_v12  ;;  %v708_v20 = vpop.f32.mrb[12].mxu1 }
 0x24d   : > { %v709_v21 = vadd.f32 %v708_v20, %v3764_v3  ;;  %v710_v22 = vpop.f32.mrb[13].mxu1  ;;  %v863_v24 = vpack.c.bf16 %v838_v14, %v835_v13 }
 0x24e   : > { %v711_v26 = vadd.f32 %v710_v22, %v3764_v3  ;;  %v712_v28 = vpop.f32.mrb[14].mxu1  ;;  %v864_v29 = vpack.c.bf16 %v839_v18, %v836_v16 }
 0x24f   : > { %v800_v30 = vmax.f32 %v709_v21, 0.0  ;;  %v713_v32 = vadd.f32 %v712_v28, %v3769_v25  ;;  %v714_v33 = vpop.f32.mrb[15].mxu1  ;;  %893 = vrot.lane.b32.xlu1 %v863_v24, %s3295_s26 }
 0x250   : > { %v801_v34 = vmax.f32 %v711_v26, 0.0  ;;  %v715_v35 = vadd.f32 %v714_v33, %v3769_v25  ;;  %895 = vrot.lane.b32.xlu0 %v864_v29, %s3295_s26 }
 0x251   : > { %v803_v36 = vmax.f32 %v713_v32, 0.0  ;;  %v841_v39 = vmul.f32 %v3727_v27, %v800_v30 }
 0x252   : > { %v804_v38 = vmax.f32 %v715_v35, 0.0  ;;  %v842_v41 = vmul.f32 %v3731_v31, %v801_v34 }
 0x253   : > { %v844_v40 = vmul.f32 %v3727_v27, %v803_v36 }
 0x254   : > { %v845_v42 = vmul.f32 %v3731_v31, %v804_v38 }
 0x255   : > { %v866_v43 = vpack.c.bf16 %v844_v40, %v841_v39 }
 0x256   : > { %v867_v45 = vpack.c.bf16 %v845_v42, %v842_v41 }
 0x257   : > { %899 = vrot.lane.b32.xlu0 %v866_v43, %s3295_s26 }
 0x258   : > { %v751_v27 = vpop.f32.mrb[16].mxu1  ;;  %901 = vrot.lane.b32.xlu1 %v867_v45, %s3295_s26 }
 0x259   : > { %v752_v47 = vadd.f32 %v751_v27, %v3717_v17  ;;  %v753_v31 = vpop.f32.mrb[17].mxu1 }
 0x25a   : > { %v754_v48 = vpop.f32.mrb[18].mxu1 }
 0x25b   : > { %v784_v49 = vmax.f32 %v752_v47, 0.0  ;;  %v755_v51 = vadd.f32 %v754_v48, %v3723_v23  ;;  %v756_v52 = vpop.f32.mrb[19].mxu1 }
 0x25d   : > { %v787_v53 = vmax.f32 %v755_v51, 0.0  ;;  %v825_v54 = vmul.f32 %v819_v50, %v784_v49 }
 0x25f   : > { %v828_v55 = vmul.f32 %v819_v50, %v787_v53 }
 0x260   : > { %v759_v56 = vpop.f32.mrb[20].mxu1 }
 0x261   : > { %v760_v58 = vadd.f32 %v759_v56, %v3736_v37  ;;  %v761_v15 = vpop.f32.mrb[21].mxu1  ;;  %v859_v59 = vpack.c.bf16 %v828_v55, %v825_v54 }
 0x262   : > { %v762_v60 = vpop.f32.mrb[22].mxu1 }
 0x263   : > { %v790_v61 = vmax.f32 %v760_v58, 0.0  ;;  %v763_v17 = vadd.f32 %v762_v60, %v3741_v44  ;;  %885 = vrot.lane.b32.xlu1 %v859_v59, %s3295_s26  ;;  %v764_v62 = vpop.f32.mrb[23].mxu1 }
 0x265   : > { %v793_v63 = vmax.f32 %v763_v17, 0.0  ;;  %v831_v19 = vmul.f32 %v819_v50, %v790_v61 }
 0x267   : > { %v834_v1 = vmul.f32 %v819_v50, %v793_v63 }
 0x268   : > { %v767_v23 = vpop.f32.mrb[24].mxu1 }
 0x269   : > { %v768_v2 = vadd.f32 %v767_v23, %v3750_v57  ;;  %v769_v5 = vpop.f32.mrb[25].mxu1  ;;  %v862_v6 = vpack.c.bf16 %v834_v1, %v831_v19 }
 0x26a   : > { %v770_v7 = vpop.f32.mrb[26].mxu1  ;;  %v2998_v5 = vld [vmem:[#allocation10 + $0x4] ss:$20 sps:$4 sm:$0xff]  }
 0x26b   : > { %v796_v8 = vmax.f32 %v768_v2, 0.0  ;;  %v771_v37 = vadd.f32 %v770_v7, %v3755_v0  ;;  %891 = vrot.lane.b32.xlu0 %v862_v6, %s3295_s26  ;;  %v772_v9 = vpop.f32.mrb[27].mxu1  ;;  %2096 = vmatprep.mubr.bf16.mxu0 %v2998_v5 }
 0x26c   : > { %2315 = vmatprep.mubr.bf16.mxu1 %v2998_v5 }
 0x26d   : > { %v799_v10 = vmax.f32 %v771_v37, 0.0  ;;  %v837_v44 = vmul.f32 %v819_v50, %v796_v8 }
 0x26f   : > { %v840_v11 = vmul.f32 %v819_v50, %v799_v10 }
 0x270   : > { %v775_v12 = vpop.f32.mrb[28].mxu1 }
 0x271   : > { %v776_v13 = vadd.f32 %v775_v12, %v3764_v3  ;;  %v777_v14 = vpop.f32.mrb[29].mxu1  ;;  %v865_v16 = vpack.c.bf16 %v840_v11, %v837_v44 }
 0x272   : > { %v778_v18 = vpop.f32.mrb[30].mxu1 }
 0x273   : > { %v802_v20 = vmax.f32 %v776_v13, 0.0  ;;  %v779_v57 = vadd.f32 %v778_v18, %v3769_v25  ;;  %897 = vrot.lane.b32.xlu1 %v865_v16, %s3295_s26  ;;  %v780_v21 = vpop.f32.mrb[31].mxu1 }
 0x275   : > { %v805_v22 = vmax.f32 %v779_v57, 0.0  ;;  %v843_v0 = vmul.f32 %v819_v50, %v802_v20 }
 0x277   : > { %v846_v24 = vmul.f32 %v819_v50, %v805_v22 }
 0x279   : > { %v868_v26 = vpack.c.bf16 %v846_v24, %v843_v0 }
 0x27b   : > { %903 = vrot.lane.b32.xlu0 %v868_v26, %s3295_s26 }
 0x2b1   : > { %v882_v28 = vpop.permute.xlu1 %881 }
 0x2b2   : > { %931 = vst.msk [vmem:[#allocation3] sm:$0xff] %vm930_vm11, %v882_v28  ;;  %v884_v3 = vpop.permute.xlu0 %883 }
 0x2b3   : > { %v3802_v29 = vsel %vm847_vm9, %v882_v28, %v884_v3 }
 0x2b4   : > { %2064 = vmatprep.subr.bf16.mxu0 %v3802_v29 }
 0x2b9   : > { %v888_v25 = vpop.permute.xlu0 %887  ;;  %v3805_v30 = vld [vmem:[#allocation3] sm:$0xff] }
 0x2ba   : > { %935 = vst.msk [vmem:[#allocation3 + $0x20] sm:$0xff] %vm930_vm11, %v888_v25  ;;  %1403 = vrot.lane.b32.xlu0 %v3805_v30, %s3290_s20  ;;  %1003 = vrot.lane.b32.xlu1 %v3805_v30, %s3286_s28  ;;  %v890_v32 = vpop.permute.xlu1 %889 }
 0x2bb   : > { %v3813_v33 = vsel %vm847_vm9, %v888_v25, %v890_v32  ;;  %2065 = vmatpush1.bf16.msra.mxu0 %v3805_v30 }
 0x2bc   : > { %2066 = vmatprep.subr.bf16.mxu0 %v3813_v33 }
 0x2be   : > { %1103 = vrot.lane.b32.xlu1 %v3805_v30, %s3287_s17  ;;  %1405 = vrot.lane.b32.xlu0 %v3802_v29, %s3290_s20 }
 0x2c1   : > { %v894_v34 = vpop.permute.xlu1 %893  ;;  %v3821_v35 = vld [vmem:[#allocation3 + $0x20] sm:$0xff] }
 0x2c2   : > { %939 = vst.msk [vmem:[#allocation3 + $0x40] sm:$0xff] %vm930_vm11, %v894_v34  ;;  %v896_v36 = vpop.permute.xlu0 %895  ;;  %1203 = vrot.lane.b32.xlu1 %v3805_v30, %s3288_s14  ;;  %1011 = vrot.lane.b32.xlu0 %v3821_v35, %s3286_s28 }
 0x2c3   : > { %v3829_v38 = vsel %vm847_vm9, %v894_v34, %v896_v36  ;;  %2067 = vmatpush1.bf16.msra.mxu0 %v3821_v35 }
 0x2c4   : > { %2068 = vmatprep.subr.bf16.mxu0 %v3829_v38 }
 0x2c6   : > { %1303 = vrot.lane.b32.xlu1 %v3805_v30, %s3289_s19  ;;  %1111 = vrot.lane.b32.xlu0 %v3821_v35, %s3287_s17 }
 0x2c9   : > { %v900_v39 = vpop.permute.xlu0 %899  ;;  %v3837_v40 = vld [vmem:[#allocation3 + $0x40] sm:$0xff] }
 0x2ca   : > { %943 = vst.msk [vmem:[#allocation3 + $0x60] sm:$0xff] %vm930_vm11, %v900_v39  ;;  %1211 = vrot.lane.b32.xlu0 %v3821_v35, %s3288_s14  ;;  %1005 = vrot.lane.b32.xlu1 %v3802_v29, %s3286_s28  ;;  %v902_v41 = vpop.permute.xlu1 %901 }
 0x2cb   : > { %v3845_v42 = vsel %vm847_vm9, %v900_v39, %v902_v41  ;;  %2069 = vmatpush1.bf16.msra.mxu0 %v3837_v40 }
 0x2cc   : > { %2070 = vmatprep.subr.bf16.mxu0 %v3845_v42 }
 0x2ce   : > { %1311 = vrot.lane.b32.xlu0 %v3821_v35, %s3289_s19  ;;  %1105 = vrot.lane.b32.xlu1 %v3802_v29, %s3287_s17 }
 0x2d1   : > { %v3853_v43 = vld [vmem:[#allocation3 + $0x60] sm:$0xff] }
 0x2d2   : > { %1411 = vrot.lane.b32.xlu0 %v3821_v35, %s3290_s20  ;;  %1205 = vrot.lane.b32.xlu1 %v3802_v29, %s3288_s14 }
 0x2d3   : > { %2071 = vmatpush1.bf16.msra.mxu0 %v3853_v43 }
 0x2d5   : > { %v886_v45 = vpop.permute.xlu1 %885 }
 0x2d6   : > { %v3861_v46 = vsel %vm847_vm9, %v884_v3, %v886_v45  ;;  %934 = vst.msk [vmem:[#allocation3 + $0x18] sm:$0xff] %vm847_vm9, %v886_v45  ;;  %1305 = vrot.lane.b32.xlu1 %v3802_v29, %s3289_s19  ;;  %1013 = vrot.lane.b32.xlu0 %v3813_v33, %s3286_s28 }
 0x2da   : > { %1113 = vrot.lane.b32.xlu0 %v3813_v33, %s3287_s17  ;;  %1019 = vrot.lane.b32.xlu1 %v3837_v40, %s3286_s28 }
 0x2dd   : > { %v892_v27 = vpop.permute.xlu0 %891  ;;  %v3912_v51 = vld [vmem:[#allocation3 + $0x18] sm:$0xff] }
 0x2de   : > { %v3873_v47 = vsel %vm847_vm9, %v890_v32, %v892_v27  ;;  %938 = vst.msk [vmem:[#allocation3 + $0x38] sm:$0xff] %vm847_vm9, %v892_v27  ;;  %1213 = vrot.lane.b32.xlu0 %v3813_v33, %s3288_s14  ;;  %1119 = vrot.lane.b32.xlu1 %v3837_v40, %s3287_s17 }
 0x2e2   : > { %1313 = vrot.lane.b32.xlu0 %v3813_v33, %s3289_s19  ;;  %1219 = vrot.lane.b32.xlu1 %v3837_v40, %s3288_s14 }
 0x2e5   : > { %v898_v31 = vpop.permute.xlu1 %897  ;;  %v3922_v52 = vld [vmem:[#allocation3 + $0x38] sm:$0xff] }
 0x2e6   : > { %v3885_v48 = vsel %vm847_vm9, %v896_v36, %v898_v31  ;;  %942 = vst.msk [vmem:[#allocation3 + $0x58] sm:$0xff] %vm847_vm9, %v898_v31  ;;  %1413 = vrot.lane.b32.xlu0 %v3813_v33, %s3290_s20  ;;  %1319 = vrot.lane.b32.xlu1 %v3837_v40, %s3289_s19 }
 0x2ea   : > { %1419 = vrot.lane.b32.xlu0 %v3837_v40, %s3290_s20  ;;  %1021 = vrot.lane.b32.xlu1 %v3829_v38, %s3286_s28 }
 0x2ed   : > { %v904_v49 = vpop.permute.xlu0 %903  ;;  %v3948_v53 = vld [vmem:[#allocation3 + $0x58] sm:$0xff] }
 0x2ee   : > { %v3897_v50 = vsel %vm847_vm9, %v902_v41, %v904_v49  ;;  %946 = vst.msk [vmem:[#allocation3 + $0x78] sm:$0xff] %vm847_vm9, %v904_v49  ;;  %1421 = vrot.lane.b32.xlu0 %v3829_v38, %s3290_s20  ;;  %1121 = vrot.lane.b32.xlu1 %v3829_v38, %s3287_s17 }
 0x2f2   : > { %1027 = vrot.lane.b32.xlu0 %v3853_v43, %s3286_s28  ;;  %1221 = vrot.lane.b32.xlu1 %v3829_v38, %s3288_s14 }
 0x2f5   : > { %v3966_v54 = vld [vmem:[#allocation3 + $0x78] sm:$0xff] }
 0x2f6   : > { %1127 = vrot.lane.b32.xlu0 %v3853_v43, %s3287_s17  ;;  %1321 = vrot.lane.b32.xlu1 %v3829_v38, %s3289_s19 }
 0x2fa   : > { %1227 = vrot.lane.b32.xlu0 %v3853_v43, %s3288_s14  ;;  %1109 = vrot.lane.b32.xlu1 %v3912_v51, %s3287_s17 }
 0x2fe   : > { %1327 = vrot.lane.b32.xlu0 %v3853_v43, %s3289_s19  ;;  %1407 = vrot.lane.b32.xlu1 %v3861_v46, %s3290_s20 }
 0x302   : > { %1029 = vrot.lane.b32.xlu0 %v3845_v42, %s3286_s28  ;;  %1117 = vrot.lane.b32.xlu1 %v3922_v52, %s3287_s17 }
 0x306   : > { %1129 = vrot.lane.b32.xlu0 %v3845_v42, %s3287_s17  ;;  %1015 = vrot.lane.b32.xlu1 %v3873_v47, %s3286_s28 }
 0x30a   : > { %1229 = vrot.lane.b32.xlu0 %v3845_v42, %s3288_s14  ;;  %1115 = vrot.lane.b32.xlu1 %v3873_v47, %s3287_s17 }
 0x30e   : > { %1329 = vrot.lane.b32.xlu0 %v3845_v42, %s3289_s19  ;;  %1215 = vrot.lane.b32.xlu1 %v3873_v47, %s3288_s14 }
 0x312   : > { %1429 = vrot.lane.b32.xlu0 %v3845_v42, %s3290_s20  ;;  %1315 = vrot.lane.b32.xlu1 %v3873_v47, %s3289_s19 }
 0x316   : > { %1415 = vrot.lane.b32.xlu1 %v3873_v47, %s3290_s20  ;;  %1007 = vrot.lane.b32.xlu0 %v3861_v46, %s3286_s28 }
 0x31a   : > { %1107 = vrot.lane.b32.xlu0 %v3861_v46, %s3287_s17  ;;  %1125 = vrot.lane.b32.xlu1 %v3948_v53, %s3287_s17 }
 0x31e   : > { %1207 = vrot.lane.b32.xlu0 %v3861_v46, %s3288_s14  ;;  %1209 = vrot.lane.b32.xlu1 %v3912_v51, %s3288_s14 }
 0x322   : > { %1307 = vrot.lane.b32.xlu0 %v3861_v46, %s3289_s19  ;;  %1507 = vrot.lane.b32.xlu1 %v3861_v46, %s3291_s25 }
 0x326   : > { %1423 = vrot.lane.b32.xlu1 %v3885_v48, %s3290_s20  ;;  %1023 = vrot.lane.b32.xlu0 %v3885_v48, %s3286_s28 }
 0x32a   : > { %1133 = vrot.lane.b32.xlu1 %v3966_v54, %s3287_s17  ;;  %1427 = vrot.lane.b32.xlu0 %v3853_v43, %s3290_s20 }
 0x32c   : > { %v3972_v55 = vpop.permute.xlu0 %1403  ;;  %v3974_v56 = vpop.permute.xlu1 %1003 }
 0x32e   : > { %1031 = vrot.lane.b32.xlu1 %v3897_v50, %s3286_s28  ;;  %1505 = vrot.lane.b32.xlu0 %v3802_v29, %s3291_s25 }
 0x330   : > { %v3980_v58 = vpop.permute.xlu0 %1405  ;;  %v3982_v15 = vpop.permute.xlu1 %1103 }
 0x332   : > { %1503 = vrot.lane.b32.xlu1 %v3805_v30, %s3291_s25  ;;  %1009 = vrot.lane.b32.xlu0 %v3912_v51, %s3286_s28 }
 0x334   : > { %v3988_v59 = vpop.permute.xlu0 %1011  ;;  %v3990_v60 = vpop.permute.xlu1 %1203 }
 0x336   : > { %1513 = vrot.lane.b32.xlu1 %v3813_v33, %s3291_s25  ;;  %1123 = vrot.lane.b32.xlu0 %v3885_v48, %s3287_s17 }
 0x338   : > { %v3996_v61 = vpop.permute.xlu0 %1111  ;;  %v3998_v17 = vpop.permute.xlu1 %1303 }
 0x33a   : > { %1017 = vrot.lane.b32.xlu1 %v3922_v52, %s3286_s28  ;;  %1223 = vrot.lane.b32.xlu0 %v3885_v48, %s3288_s14 }
 0x33c   : > { %v4004_v62 = vpop.permute.xlu0 %1211  ;;  %v4006_v63 = vpop.permute.xlu1 %1005 }
 0x33e   : > { %1131 = vrot.lane.b32.xlu1 %v3897_v50, %s3287_s17  ;;  %1323 = vrot.lane.b32.xlu0 %v3885_v48, %s3289_s19  ;;  %s2503_s17 = scalar_lea.sflag [#allocation6], %s3570_s10 }
 0x340   : > { %v4012_v19 = vpop.permute.xlu0 %1311  ;;  %v4014_v1 = vpop.permute.xlu1 %1105 }
 0x342   : > { %1225 = vrot.lane.b32.xlu1 %v3948_v53, %s3288_s14  ;;  %1217 = vrot.lane.b32.xlu0 %v3922_v52, %s3288_s14 }
 0x344   : > { %v4020_v23 = vpop.permute.xlu0 %1411  ;;  %v4022_v2 = vpop.permute.xlu1 %1205 }
 0x345   : > { %4618 = vst [vmem:[#allocation21_spill] sm:$0xff] %v4020_v23 }
 0x346   : > { %1523 = vrot.lane.b32.xlu1 %v3885_v48, %s3291_s25  ;;  %1515 = vrot.lane.b32.xlu0 %v3873_v47, %s3291_s25 }
 0x348   : > { %v4028_v6 = vpop.permute.xlu0 %1013  ;;  %v4030_v7 = vpop.permute.xlu1 %1305 }
 0x34a   : > { %1519 = vrot.lane.b32.xlu1 %v3837_v40, %s3291_s25  ;;  %1511 = vrot.lane.b32.xlu0 %v3821_v35, %s3291_s25 }
 0x34c   : > { %v4036_v8 = vpop.permute.xlu0 %1113  ;;  %v4038_v37 = vpop.permute.xlu1 %1019 }
 0x34e   : > { %1231 = vrot.lane.b32.xlu1 %v3897_v50, %s3288_s14  ;;  %1521 = vrot.lane.b32.xlu0 %v3829_v38, %s3291_s25 }
 0x350   : > { %v4044_v9 = vpop.permute.xlu0 %1213  ;;  %v4046_v10 = vpop.permute.xlu1 %1119 }
 0x352   : > { %1529 = vrot.lane.b32.xlu1 %v3845_v42, %s3291_s25  ;;  %1025 = vrot.lane.b32.xlu0 %v3948_v53, %s3286_s28 }
 0x354   : > { %v4052_v44 = vpop.permute.xlu0 %1313  ;;  %v4054_v11 = vpop.permute.xlu1 %1219 }
 0x356   : > { %1033 = vrot.lane.b32.xlu1 %v3966_v54, %s3286_s28  ;;  %1233 = vrot.lane.b32.xlu0 %v3966_v54, %s3288_s14  ;;  %s4534_s28 = scalar_lea.hbm %s4592_s6, %s2860_s11  ;;  %s3194_s14 = scalar_lea.vmem %s4536_s12, 3072 }
 0x357   : > { %p3195_p2 = scmp.ne.s32.totalorder %s4536_s12, %s3194_s14 }
 0x358   : > { %v4060_v12 = vpop.permute.xlu0 %1413  ;;  %v4062_v13 = vpop.permute.xlu1 %1319 }
 0x359   : > { %4619 = vst [vmem:[#allocation22_spill] sm:$0xff] %v4060_v12  ;;  %p3196_p10 = pnand %p3195_p2, %p4633_p7 }
 0x35a   : > { %1509 = vrot.lane.b32.xlu1 %v3912_v51, %s3291_s25  ;;  %1527 = vrot.lane.b32.xlu0 %v3853_v43, %s3291_s25 }
 0x35b   : > { %p3197_p1 = pneg %p3196_p10 }
 0x35c   : > { %v4068_v14 = vpop.permute.xlu0 %1419  ;;  %v4070_v16 = vpop.permute.xlu1 %1021 }
 0x35d   : > { %4620 = vst [vmem:[#allocation23_spill] sm:$0xff] %v4068_v14 }
 0x35e   : > { %1331 = vrot.lane.b32.xlu1 %v3897_v50, %s3289_s19  ;;  %1605 = vrot.lane.b32.xlu0 %v3802_v29, %s3292_s13 }
 0x360   : > { %v4076_v18 = vpop.permute.xlu0 %1421  ;;  %v4078_v20 = vpop.permute.xlu1 %1121 }
 0x361   : > { %4621 = vst [vmem:[#allocation24_spill] sm:$0xff] %v4076_v18 }
 0x362   : > { %1607 = vrot.lane.b32.xlu1 %v3861_v46, %s3292_s13  ;;  %1309 = vrot.lane.b32.xlu0 %v3912_v51, %s3289_s19 }
 0x364   : > { %v4084_v57 = vpop.permute.xlu0 %1027  ;;  %v4086_v21 = vpop.permute.xlu1 %1221 }
 0x366   : > { %1603 = vrot.lane.b32.xlu1 %v3805_v30, %s3292_s13  ;;  %1517 = vrot.lane.b32.xlu0 %v3922_v52, %s3291_s25 }
 0x368   : > { %v4092_v22 = vpop.permute.xlu0 %1127  ;;  %v4094_v0 = vpop.permute.xlu1 %1321 }
 0x36a   : > { %1613 = vrot.lane.b32.xlu1 %v3813_v33, %s3292_s13  ;;  %1615 = vrot.lane.b32.xlu0 %v3873_v47, %s3292_s13 }
 0x36c   : > { %v4100_v24 = vpop.permute.xlu0 %1227  ;;  %v1110_v26 = vpop.permute.xlu1 %1109 }
 0x36e   : > { %1431 = vrot.lane.b32.xlu1 %v3897_v50, %s3290_s20  ;;  %1611 = vrot.lane.b32.xlu0 %v3821_v35, %s3292_s13 }
 0x370   : > { %v4106_v28 = vpop.permute.xlu0 %1327  ;;  %v4108_v3 = vpop.permute.xlu1 %1407 }
 0x372   : > { %1317 = vrot.lane.b32.xlu1 %v3922_v52, %s3289_s19  ;;  %1621 = vrot.lane.b32.xlu0 %v3829_v38, %s3292_s13 }
 0x374   : > { %v4114_v25 = vpop.permute.xlu0 %1029  ;;  %v1118_v32 = vpop.permute.xlu1 %1117 }
 0x376   : > { %1525 = vrot.lane.b32.xlu1 %v3948_v53, %s3291_s25  ;;  %1325 = vrot.lane.b32.xlu0 %v3948_v53, %s3289_s19 }
 0x378   : > { %v4120_v34 = vpop.permute.xlu0 %1129  ;;  %v4122_v36 = vpop.permute.xlu1 %1015 }
 0x379   : > { %v1039_v23 = vsel %vm376_vm1, %v4028_v6, %v4122_v36 }
 0x37a   : > { %1623 = vrot.lane.b32.xlu1 %v3885_v48, %s3292_s13  ;;  %1531 = vrot.lane.b32.xlu0 %v3897_v50, %s3291_s25 }
 0x37c   : > { %v4128_v39 = vpop.permute.xlu0 %1229  ;;  %v4130_v41 = vpop.permute.xlu1 %1115 }
 0x37e   : > { %1533 = vrot.lane.b32.xlu0 %v3966_v54, %s3291_s25  ;;  %1619 = vrot.lane.b32.xlu1 %v3837_v40, %s3292_s13 }
 0x380   : > { %v4136_v45 = vpop.permute.xlu0 %1329  ;;  %v4138_v27 = vpop.permute.xlu1 %1215 }
 0x382   : > { %1627 = vrot.lane.b32.xlu0 %v3853_v43, %s3292_s13  ;;  %1629 = vrot.lane.b32.xlu1 %v3845_v42, %s3292_s13 }
 0x384   : > { %v4144_v31 = vpop.permute.xlu0 %1429  ;;  %v4146_v49 = vpop.permute.xlu1 %1315 }
 0x385   : > { %4622 = vst [vmem:[#allocation25_spill] sm:$0xff] %v4144_v31  ;;  %v1035_v31 = vsel %vm376_vm1, %v3974_v56, %v4006_v63  ;;  %v1038_v56 = vsel %vm376_vm1, %v3988_v59, %v4028_v6 }
 0x386   : > { %1409 = vrot.lane.b32.xlu0 %v3912_v51, %s3290_s20  ;;  %1333 = vrot.lane.b32.xlu1 %v3966_v54, %s3289_s19  ;;  %s3296_s19 = smov [#allocation15]  }
 0x388   : > { %v4152_v5 = vpop.permute.xlu0 %1007  ;;  %v4154_v4 = vpop.permute.xlu1 %1415 }
 0x389   : > { %4623 = vst [vmem:[#allocation26_spill] sm:$0xff] %v4154_v4  ;;  %v1036_v14 = vsel %vm376_vm1, %v4006_v63, %v4152_v5 }
 0x38a   : > { %1631 = vrot.lane.b32.xlu0 %v3897_v50, %s3292_s13  ;;  %1609 = vrot.lane.b32.xlu1 %v3912_v51, %s3292_s13 }
 0x38b   : > { %2072 = vmatprep.subr.bf16.mxu0 %v1036_v14 }
 0x38c   : > { %2073 = vmatpush1.bf16.msra.mxu0 %v1035_v31  ;;  %v1108_v18 = vpop.permute.xlu0 %1107  ;;  %v1126_v12 = vpop.permute.xlu1 %1125  ;;  %v1041_v31 = vsel %vm376_vm1, %v4038_v37, %v4070_v16 }
 0x38d   : > { %2074 = vmatprep.subr.bf16.mxu0 %v1039_v23  ;;  %v1137_v4 = vsel %vm394_vm2, %v1108_v18, %v1110_v26  ;;  %v1140_v23 = vsel %vm394_vm2, %v4130_v41, %v1118_v32 }
 0x38e   : > { %1417 = vrot.lane.b32.xlu0 %v3922_v52, %s3290_s20  ;;  %1617 = vrot.lane.b32.xlu1 %v3922_v52, %s3292_s13 }
 0x38f   : > { %2707 = vmatprep.subr.bf16.mxu1 %v1137_v4 }
 0x390   : > { %2075 = vmatpush1.bf16.msra.mxu0 %v1038_v56  ;;  %2708 = vmatpush3.bf16.msra.mxu1 %v3861_v46  ;;  %v4178_v63 = vpop.permute.xlu0 %1207  ;;  %v4182_v14 = vpop.permute.xlu1 %1209 }
 0x391   : > { %2709 = vmatprep.subr.bf16.mxu1 %v1140_v23 }
 0x392   : > { %1425 = vrot.lane.b32.xlu0 %v3948_v53, %s3290_s20  ;;  %1625 = vrot.lane.b32.xlu1 %v3948_v53, %s3292_s13 }
 0x394   : > { %2710 = vmatpush3.bf16.msra.mxu1 %v3873_v47  ;;  %v4189_v4 = vpop.permute.xlu0 %1307  ;;  %v4191_v59 = vpop.permute.xlu1 %1507 }
 0x396   : > { %1433 = vrot.lane.b32.xlu0 %v3966_v54, %s3290_s20  ;;  %1633 = vrot.lane.b32.xlu1 %v3966_v54, %s3292_s13  ;;  %s3198_s20 = sshll.u32 %s3296_s19, 4  ;;  %s3199_s20 = int_to_ptr.vmem [resolvable:$false] %s3198_s20 }
 0x397   : > { %s3200_s25 = scalar_lea.vmem %s3199_s20, 6144  ;;  %p3201_p11 = scmp.lt.s32.totalorder %s4536_s12, %s3199_s20 }
 0x398   : > { %v4197_v6 = vpop.permute.xlu0 %1023  ;;  %v4199_v26 = vpop.permute.xlu1 %1423  ;;  %p3202_p12 = scmp.lt.s32.totalorder %s3200_s25, %s3194_s14 }
 0x399   : > { %4624 = vst [vmem:[#allocation27_spill] sm:$0xff] %v4199_v26  ;;  %v1042_v32 = vsel %vm376_vm1, %v4070_v16, %v4197_v6  ;;  %v1136_v16 = vsel %vm394_vm2, %v4014_v1, %v1108_v18  ;;  %v1139_v18 = vsel %vm394_vm2, %v4036_v8, %v4130_v41 }
 0x39a   : > { %1707 = vrot.lane.b32.xlu0 %v3861_v46, %s3294_s16  ;;  %1705 = vrot.lane.b32.xlu1 %v3802_v29, %s3294_s16  ;;  %p3203_p13 = por %p3202_p12, %p3201_p11 }
 0x39b   : > { %2076 = vmatprep.subr.bf16.mxu0 %v1042_v32 }
 0x39c   : > { %2077 = vmatpush1.bf16.msra.mxu0 %v1041_v31  ;;  %v4211_v56 = vpop.permute.xlu0 %1427  ;;  %v1134_v23 = vpop.permute.xlu1 %1133  ;;  %p3204_p8 = pnand %p3203_p13, %p3197_p1 }
 0x39e   : > { %1713 = vrot.lane.b32.xlu0 %v3813_v33, %s3294_s16  ;;  %1703 = vrot.lane.b32.xlu1 %v3805_v30, %s3294_s16  ;;  %v1044_v30 = vsel %vm376_vm1, %v4084_v57, %v4114_v25 }
 0x3a0   : > { %v1506_v26 = vpop.permute.xlu0 %1505  ;;  %v4217_v46 = vpop.permute.xlu1 %1031 }
 0x3a1   : > { %v1045_v29 = vsel %vm376_vm1, %v4114_v25, %v4217_v46  ;;  %v4224_v37 = vsel %vm466_vm6, %v1506_v26, %v4191_v59 }
 0x3a2   : > { %1711 = vrot.lane.b32.xlu0 %v3821_v35, %s3294_s16  ;;  %1715 = vrot.lane.b32.xlu1 %v3873_v47, %s3294_s16  ;;  %v1135_v35 = vsel %vm394_vm2, %v3982_v15, %v4014_v1 }
 0x3a3   : > { %2078 = vmatprep.subr.bf16.mxu0 %v1045_v29 }
 0x3a4   : > { %2079 = vmatpush1.bf16.msra.mxu0 %v1044_v30  ;;  %v1010_v33 = vpop.permute.xlu0 %1009  ;;  %v1504_v32 = vpop.permute.xlu1 %1503 }
 0x3a5   : > { %2080 = vmatprep.subr.bf16.mxu0 %v1136_v16  ;;  %v4236_v31 = vsel %vm466_vm6, %v1504_v32, %v1506_v26  ;;  %v1905_v26 = vld [vmem:[#allocation12 + $0x10] sm:$0xff] }
 0x3a6   : > { %1723 = vrot.lane.b32.xlu0 %v3885_v48, %s3294_s16  ;;  %1721 = vrot.lane.b32.xlu1 %v3829_v38, %s3294_s16  ;;  %v1138_v38 = vsel %vm394_vm2, %v3996_v61, %v4036_v8 }
 0x3a8   : > { %2081 = vmatpush1.bf16.msra.mxu0 %v1135_v35  ;;  %v1124_v47 = vpop.permute.xlu0 %1123  ;;  %v4248_v57 = vpop.permute.xlu1 %1513  ;;  %v1244_v35 = vsel %vm412_vm3, %v4100_v24, %v4128_v39  ;;  %v1335_v24 = vsel %vm430_vm4, %v3998_v17, %v4030_v7 }
 0x3a9   : > { %2082 = vmatprep.subr.bf16.mxu0 %v1139_v18  ;;  %v1143_v25 = vsel %vm394_vm2, %v1124_v47, %v1126_v12  ;;  %v1142_v1 = vsel %vm394_vm2, %v4078_v20, %v1124_v47  ;;  %v1236_v12 = vsel %vm412_vm3, %v4022_v2, %v4178_v63  ;;  %v2996_v47 = vld [vmem:[#allocation10] ss:$20 sps:$4 sm:$0xff]   ;;  %v1910_v18 = vld [vmem:[#allocation12 + $0x38] sm:$0xff] }
 0x3aa   : > { %1729 = vrot.lane.b32.xlu0 %v3845_v42, %s3294_s16  ;;  %1719 = vrot.lane.b32.xlu1 %v3837_v40, %s3294_s16  ;;  %v1141_v40 = vsel %vm394_vm2, %v4046_v10, %v4078_v20 }
 0x3ab   : > { %2711 = vmatprep.subr.bf16.mxu1 %v1143_v25  ;;  %v1909_v25 = vld [vmem:[#allocation12 + $0x30] sm:$0xff] }
 0x3ac   : > { %2083 = vmatpush1.bf16.msra.mxu0 %v1138_v38  ;;  %2712 = vmatpush3.bf16.msra.mxu1 %v3885_v48  ;;  %v1224_v15 = vpop.permute.xlu0 %1223  ;;  %v1018_v41 = vpop.permute.xlu1 %1017 }
 0x3ad   : > { %2084 = vmatprep.subr.bf16.mxu0 %v1142_v1  ;;  %v2999_v1 = vld [vmem:[#allocation10 + $0x2c] ss:$20 sps:$4 sm:$0xff]  }
 0x3ae   : > { %1727 = vrot.lane.b32.xlu0 %v3853_v43, %s3294_s16  ;;  %1731 = vrot.lane.b32.xlu1 %v3897_v50, %s3294_s16  ;;  %v1144_v43 = vsel %vm394_vm2, %v4092_v22, %v4120_v34  ;;  %v1904_v22 = vld [vmem:[#allocation12 + $0x8] sm:$0xff] }
 0x3b0   : > { %2085 = vmatpush1.bf16.msra.mxu0 %v1141_v40  ;;  %v4268_v42 = vpop.permute.xlu0 %1323  ;;  %v1132_v48 = vpop.permute.xlu1 %1131 }
 0x3b1   : > { %v1145_v61 = vsel %vm394_vm2, %v4120_v34, %v1132_v48  ;;  %v1146_v8 = vsel %vm394_vm2, %v1132_v48, %v1134_v23  ;;  %v1903_v34 = vld [vmem:[#allocation12] sm:$0xff] }
 0x3b2   : > { %1717 = vrot.lane.b32.xlu0 %v3922_v52, %s3294_s16  ;;  %1709 = vrot.lane.b32.xlu1 %v3912_v51, %s3294_s16  ;;  %v1237_v52 = vsel %vm412_vm3, %v4178_v63, %v4182_v14  ;;  %v1235_v51 = vsel %vm412_vm3, %v3990_v60, %v4022_v2  ;;  %v1040_v60 = vsel %vm376_vm1, %v4122_v36, %v1018_v41  ;;  %v1907_v36 = vld [vmem:[#allocation12 + $0x20] sm:$0xff] }
 0x3b3   : > { %2086 = vmatprep.subr.bf16.mxu0 %v1145_v61  ;;  %2713 = vmatprep.subr.bf16.mxu1 %v1146_v8  ;;  %v1238_v2 = vsel %vm412_vm3, %v4004_v62, %v4044_v9  ;;  %v1241_v62 = vsel %vm412_vm3, %v4054_v11, %v4086_v21  ;;  %v1339_v41 = vsel %vm430_vm4, %v4052_v44, %v4146_v49 }
 0x3b4   : > { %2087 = vmatpush1.bf16.msra.mxu0 %v1144_v43  ;;  %2714 = vmatpush3.bf16.msra.mxu1 %v3897_v50  ;;  %v1218_v10 = vpop.permute.xlu0 %1217  ;;  %v1226_v20 = vpop.permute.xlu1 %1225  ;;  %v1037_v50 = vsel %vm376_vm1, %v4152_v5, %v1010_v33  ;;  %v1906_v5 = vld [vmem:[#allocation12 + $0x18] sm:$0xff]  ;;  %v1338_v61 = vsel %vm430_vm4, %v4012_v19, %v4052_v44  ;;  %v1341_v19 = vsel %vm430_vm4, %v4062_v13, %v4094_v0 }
 0x3b5   : > { %2088 = vmatprep.subr.bf16.mxu0 %v1236_v12  ;;  %2715 = vmatprep.subr.bf16.mxu1 %v1237_v52  ;;  %v1243_v29 = vsel %vm412_vm3, %v1224_v15, %v1226_v20  ;;  %v3001_v43 = vld [vmem:[#allocation10 + $0x28] ss:$20 sps:$4 sm:$0xff]   ;;  %v1344_v52 = vsel %vm430_vm4, %v4106_v28, %v4136_v45  ;;  %v1436_v13 = vsel %vm448_vm5, %v3980_v58, %v4108_v3  ;;  %v3004_v28 = vld [vmem:[#allocation10 + $0x50] ss:$20 sps:$4 sm:$0xff]  }
 0x3b6   : > { %1733 = vrot.lane.b32.xlu0 %v3966_v54, %s3294_s16  ;;  %1725 = vrot.lane.b32.xlu1 %v3948_v53, %s3294_s16  ;;  %v1239_v54 = vsel %vm412_vm3, %v4044_v9, %v4138_v27  ;;  %v1240_v53 = vsel %vm412_vm3, %v4138_v27, %v1218_v10  ;;  %v1242_v27 = vsel %vm412_vm3, %v4086_v21, %v1224_v15  ;;  %v1908_v9 = vld [vmem:[#allocation12 + $0x28] sm:$0xff] }
 0x3b7   : > { %v1336_v21 = vsel %vm430_vm4, %v4030_v7, %v4189_v4  ;;  %v1342_v7 = vsel %vm430_vm4, %v4094_v0, %v4268_v42  ;;  %v3002_v10 = vld [vmem:[#allocation10 + $0x54] ss:$20 sps:$4 sm:$0xff]  }
 0x3b8   : > { %2089 = vmatpush1.bf16.msra.mxu0 %v1235_v51  ;;  %2716 = vmatpush3.bf16.msra.mxu1 %v1037_v50  ;;  %v4296_v63 = vpop.permute.xlu0 %1515  ;;  %v4303_v14 = vpop.permute.xlu1 %1523  ;;  %v1435_v51 = vsel %vm448_vm5, %v3972_v55, %v3980_v58  ;;  %v4627_v55 = vld [vmem:[#allocation21_spill] sm:$0xff] }
 0x3b9   : > { %2090 = vmatprep.subr.bf16.mxu0 %v1239_v54  ;;  %2717 = vmatprep.subr.bf16.mxu1 %v1240_v53 }
 0x3ba   : > { %1918 = vperm.xlu0 %2976, %v1904_v22   ;;  %1913 = vperm.xlu1 %2977, %v1903_v34   ;;  %v4625_v22 = vld [vmem:[#allocation26_spill] sm:$0xff] }
 0x3bb   : > { %v4626_v34 = vld [vmem:[#allocation22_spill] sm:$0xff] }
 0x3bc   : > { %2091 = vmatpush1.bf16.msra.mxu0 %v1238_v2  ;;  %2718 = vmatpush3.bf16.msra.mxu1 %v1040_v60  ;;  %v4310_v23 = vpop.permute.xlu0 %1511  ;;  %v4315_v30 = vpop.permute.xlu1 %1519  ;;  %v1439_v54 = vsel %vm448_vm5, %v4626_v34, %v4625_v22  ;;  %v3005_v60 = vld [vmem:[#allocation10 + $0x7c] ss:$20 sps:$4 sm:$0xff]   ;;  %v1438_v58 = vsel %vm448_vm5, %v4627_v55, %v4626_v34  ;;  %v3011_v34 = vld [vmem:[#allocation10 + $0x34] ss:$20 sps:$4 sm:$0xff]  }
 0x3bd   : > { %2092 = vmatprep.subr.bf16.mxu0 %v1242_v27  ;;  %2719 = vmatprep.subr.bf16.mxu1 %v1243_v29 }
 0x3be   : > { %1928 = vperm.xlu0 %2976, %v1906_v5   ;;  %1923 = vperm.xlu1 %2977, %v1905_v26   ;;  %v4628_v5 = vld [vmem:[#allocation27_spill] sm:$0xff]  ;;  %v4629_v26 = vld [vmem:[#allocation24_spill] sm:$0xff] }
 0x3bf   : > { %v1442_v27 = vsel %vm448_vm5, %v4629_v26, %v4628_v5 }
 0x3c0   : > { %2093 = vmatpush1.bf16.msra.mxu0 %v1241_v62  ;;  %v4320_v33 = vpop.permute.xlu0 %1521  ;;  %v1232_v16 = vpop.permute.xlu1 %1231  ;;  %v3010_v62 = vld [vmem:[#allocation10 + $0xc] ss:$20 sps:$4 sm:$0xff]  }
 0x3c1   : > { %v1245_v32 = vsel %vm412_vm3, %v4128_v39, %v1232_v16 }
 0x3c2   : > { %1938 = vperm.xlu0 %2976, %v1908_v9   ;;  %1933 = vperm.xlu1 %2977, %v1907_v36   ;;  %v4630_v9 = vld [vmem:[#allocation23_spill] sm:$0xff] }
 0x3c3   : > { %2094 = vmatprep.subr.bf16.mxu0 %v1245_v32  ;;  %v1441_v36 = vsel %vm448_vm5, %v4630_v9, %v4629_v26 }
 0x3c4   : > { %2095 = vmatpush1.bf16.msra.mxu0 %v1244_v35  ;;  %v1026_v11 = vpop.permute.xlu0 %1025  ;;  %v4330_v38 = vpop.permute.xlu1 %1529 }
 0x3c5   : > { %v1043_v15 = vsel %vm376_vm1, %v4197_v6, %v1026_v11  ;;  %2137 = vmatprep.subr.bf16.mxu0 %v1336_v21 }
 0x3c6   : > { %1948 = vperm.xlu0 %2976, %v1910_v18   ;;  %1943 = vperm.xlu1 %2977, %v1909_v25  }
 0x3c7   : > { %2720 = vmatpush3.bf16.msra.mxu1 %v1043_v15  ;;  %2097 = vmatmul.mubr.bf16.vlgmr.msra.gmra.mrb[0].mxu0 %v2996_v47 }
 0x3c8   : > { %2138 = vmatpush1.bf16.msra.mxu0 %v1335_v24  ;;  %v1234_v39 = vpop.permute.xlu0 %1233  ;;  %v1034_v40 = vpop.permute.xlu1 %1033  ;;  %2106 = vmatprep.mubr.bf16.mxu0 %v2999_v1  ;;  %v1539_v24 = vsel %vm466_vm6, %v4248_v57, %v4296_v63 }
 0x3c9   : > { %2139 = vmatprep.subr.bf16.mxu0 %v1339_v41  ;;  %v1046_v6 = vsel %vm376_vm1, %v4217_v46, %v1034_v40  ;;  %v1246_v48 = vsel %vm412_vm3, %v1232_v16, %v1234_v39  ;;  %v3007_v16 = vld [vmem:[#allocation10 + $0x78] ss:$20 sps:$4 sm:$0xff]  }
 0x3ca   : > { %2721 = vmatprep.subr.bf16.mxu1 %v1246_v48 }
 0x3cb   : > { %2722 = vmatpush3.bf16.msra.mxu1 %v1046_v6 }
 0x3cc   : > { %2140 = vmatpush1.bf16.msra.mxu0 %v1338_v61  ;;  %v4346_v17 = vpop.permute.xlu0 %1527  ;;  %v1510_v8 = vpop.permute.xlu1 %1509 }
 0x3cd   : > { %2141 = vmatprep.subr.bf16.mxu0 %v1342_v7  ;;  %v1537_v46 = vsel %vm466_vm6, %v4191_v59, %v1510_v8 }
 0x3ce   : > { %2316 = vmatmul.mubr.bf16.vlgmr.msra.gmra.mrb[32].mxu1 %v2996_v47  ;;  %2747 = vmatprep.subr.bf16.mxu1 %v1537_v46  ;;  %v4631_v47 = vld [vmem:[#allocation25_spill] sm:$0xff] }
 0x3cf   : > { %2323 = vmatprep.mubr.bf16.mxu1 %v2999_v1  ;;  %2107 = vmatmul.mubr.bf16.gmra.mrb[4].mxu0 %v3001_v43  ;;  %v1444_v25 = vsel %vm448_vm5, %v4211_v56, %v4631_v47 }
 0x3d0   : > { %2142 = vmatpush1.bf16.msra.mxu0 %v1341_v19  ;;  %v4356_v44 = vpop.permute.xlu0 %1605  ;;  %v4358_v12 = vpop.permute.xlu1 %1331  ;;  %2116 = vmatprep.mubr.bf16.mxu0 %v3002_v10 }
 0x3d1   : > { %v1345_v59 = vsel %vm430_vm4, %v4136_v45, %v4358_v12 }
 0x3d2   : > { %2143 = vmatprep.subr.bf16.mxu0 %v1345_v59 }
 0x3d4   : > { %2144 = vmatpush1.bf16.msra.mxu0 %v1344_v52  ;;  %v1310_v20 = vpop.permute.xlu0 %1309  ;;  %v4369_v0 = vpop.permute.xlu1 %1607 }
 0x3d5   : > { %v1337_v50 = vsel %vm430_vm4, %v4189_v4, %v1310_v20  ;;  %2145 = vmatprep.subr.bf16.mxu0 %v1436_v13 }
 0x3d6   : > { %2324 = vmatmul.mubr.bf16.gmra.mrb[36].mxu1 %v3001_v43 }
 0x3d7   : > { %2748 = vmatpush3.bf16.msra.mxu1 %v1337_v50  ;;  %2331 = vmatprep.mubr.bf16.mxu1 %v3002_v10 }
 0x3d8   : > { %2146 = vmatpush1.bf16.msra.mxu0 %v1435_v51  ;;  %v1518_v45 = vpop.permute.xlu0 %1517  ;;  %v4379_v53 = vpop.permute.xlu1 %1603 }
 0x3d9   : > { %2147 = vmatprep.subr.bf16.mxu0 %v1439_v54  ;;  %v1540_v4 = vsel %vm466_vm6, %v4296_v63, %v1518_v45  ;;  %2117 = vmatmul.mubr.bf16.gmra.mrb[8].mxu0 %v3004_v28  ;;  %v1542_v63 = vsel %vm466_vm6, %v4320_v33, %v4303_v14  ;;  %v1635_v61 = vsel %vm484_vm7, %v4379_v53, %v4356_v44 }
 0x3da   : > { %2749 = vmatprep.subr.bf16.mxu1 %v1540_v4  ;;  %2126 = vmatprep.mubr.bf16.mxu0 %v3005_v60 }
 0x3dc   : > { %2148 = vmatpush1.bf16.msra.mxu0 %v1438_v58  ;;  %v4386_v2 = vpop.permute.xlu0 %1615  ;;  %v1614_v29 = vpop.permute.xlu1 %1613  ;;  %v3013_v58 = vld [vmem:[#allocation10 + $0x30] ss:$20 sps:$4 sm:$0xff]  }
 0x3dd   : > { %2149 = vmatprep.subr.bf16.mxu0 %v1442_v27  ;;  %v1639_v8 = vsel %vm484_vm7, %v1614_v29, %v4386_v2  ;;  %v3014_v27 = vld [vmem:[#allocation10 + $0x5c] ss:$20 sps:$4 sm:$0xff]  }
 0x3de   : > { %2332 = vmatmul.mubr.bf16.gmra.mrb[40].mxu1 %v3004_v28 }
 0x3df   : > { %2339 = vmatprep.mubr.bf16.mxu1 %v3005_v60 }
 0x3e0   : > { %2150 = vmatpush1.bf16.msra.mxu0 %v1441_v36  ;;  %v1612_v32 = vpop.permute.xlu0 %1611  ;;  %v4394_v35 = vpop.permute.xlu1 %1431  ;;  %v3016_v36 = vld [vmem:[#allocation10 + $0x58] ss:$20 sps:$4 sm:$0xff]  }
 0x3e1   : > { %v1445_v18 = vsel %vm448_vm5, %v4631_v47, %v4394_v35  ;;  %2127 = vmatmul.mubr.bf16.gmra.mrb[12].mxu0 %v3007_v16 }
 0x3e2   : > { %2151 = vmatprep.subr.bf16.mxu0 %v1445_v18  ;;  %2169 = vmatprep.mubr.bf16.mxu0 %v3010_v62 }
 0x3e4   : > { %2152 = vmatpush1.bf16.msra.mxu0 %v1444_v25  ;;  %v1622_v11 = vpop.permute.xlu0 %1621  ;;  %v1318_v21 = vpop.permute.xlu1 %1317 }
 0x3e5   : > { %2153 = vmatprep.subr.bf16.mxu0 %v4224_v37  ;;  %v1340_v15 = vsel %vm430_vm4, %v4146_v49, %v1318_v21  ;;  %v1538_v49 = vsel %vm466_vm6, %v4310_v23, %v4248_v57 }
 0x3e6   : > { %2340 = vmatmul.mubr.bf16.gmra.mrb[44].mxu1 %v3007_v16 }
 0x3e7   : > { %2750 = vmatpush3.bf16.msra.mxu1 %v1340_v15  ;;  %2380 = vmatprep.mubr.bf16.mxu1 %v3010_v62  ;;  %v3019_v15 = vld [vmem:[#allocation10 + $0x80] ss:$20 sps:$4 sm:$0xff]  }
 0x3e8   : > { %2154 = vmatpush1.bf16.msra.mxu0 %v4236_v31  ;;  %v1326_v1 = vpop.permute.xlu0 %1325  ;;  %v1526_v39 = vpop.permute.xlu1 %1525 }
 0x3e9   : > { %v1343_v56 = vsel %vm430_vm4, %v4268_v42, %v1326_v1  ;;  %2155 = vmatprep.subr.bf16.mxu0 %v1539_v24  ;;  %v1543_v37 = vsel %vm466_vm6, %v4303_v14, %v1526_v39  ;;  %v1541_v42 = vsel %vm466_vm6, %v4315_v30, %v4320_v33  ;;  %v1544_v14 = vsel %vm466_vm6, %v4346_v17, %v4330_v38 }
 0x3ea   : > { %2751 = vmatprep.subr.bf16.mxu1 %v1543_v37  ;;  %v1636_v30 = vsel %vm484_vm7, %v4356_v44, %v4369_v0  ;;  %v1638_v17 = vsel %vm484_vm7, %v1612_v32, %v1614_v29 }
 0x3eb   : > { %2752 = vmatpush3.bf16.msra.mxu1 %v1343_v56 }
 0x3ec   : > { %2156 = vmatpush1.bf16.msra.mxu0 %v1538_v49  ;;  %v1532_v31 = vpop.permute.xlu0 %1531  ;;  %v1624_v41 = vpop.permute.xlu1 %1623  ;;  %v4632_v49 = vmov 0  }
 0x3ed   : > { %2157 = vmatprep.subr.bf16.mxu0 %v1542_v63  ;;  %v1545_v6 = vsel %vm466_vm6, %v4330_v38, %v1532_v31  ;;  %v1642_v10 = vsel %vm484_vm7, %v1622_v11, %v1624_v41 }
 0x3f0   : > { %2158 = vmatpush1.bf16.msra.mxu0 %v1541_v42  ;;  %v1534_v40 = vpop.permute.xlu0 %1533  ;;  %v1620_v48 = vpop.permute.xlu1 %1619 }
 0x3f1   : > { %2159 = vmatprep.subr.bf16.mxu0 %v1545_v6  ;;  %v1546_v57 = vsel %vm466_vm6, %v1532_v31, %v1534_v40  ;;  %v1641_v52 = vsel %vm484_vm7, %v1620_v48, %v1622_v11 }
 0x3f2   : > { %2753 = vmatprep.subr.bf16.mxu1 %v1546_v57 }
 0x3f4   : > { %2160 = vmatpush1.bf16.msra.mxu0 %v1544_v14  ;;  %v1628_v23 = vpop.permute.xlu0 %1627  ;;  %v1630_v33 = vpop.permute.xlu1 %1629 }
 0x3f5   : > { %2161 = vmatprep.subr.bf16.mxu0 %v1636_v30 }
 0x3f8   : > { %2162 = vmatpush1.bf16.msra.mxu0 %v1635_v61  ;;  %v1410_v7 = vpop.permute.xlu0 %1409  ;;  %v1334_v46 = vpop.permute.xlu1 %1333  ;;  %v3022_v61 = vld [vmem:[#allocation10 + $0x60] ss:$20 sps:$4 sm:$0xff]  }
 0x3f9   : > { %2163 = vmatprep.subr.bf16.mxu0 %v1639_v8  ;;  %v1346_v38 = vsel %vm430_vm4, %v4358_v12, %v1334_v46  ;;  %v1437_v59 = vsel %vm448_vm5, %v4108_v3, %v1410_v7  ;;  %v3008_v3 = vld [vmem:[#allocation10 + $0x8] ss:$20 sps:$4 sm:$0xff]  }
 0x3fa   : > { %2754 = vmatpush3.bf16.msra.mxu1 %v1346_v38  ;;  %v3023_v7 = vld [vmem:[#allocation10 + $0x88] ss:$20 sps:$4 sm:$0xff]  }
 0x3fc   : > { %2164 = vmatpush1.bf16.msra.mxu0 %v1638_v17  ;;  %v1632_v43 = vpop.permute.xlu0 %1631  ;;  %v1610_v19 = vpop.permute.xlu1 %1609 }
 0x3fd   : > { %2165 = vmatprep.subr.bf16.mxu0 %v1642_v10  ;;  %v1637_v44 = vsel %vm484_vm7, %v4369_v0, %v1610_v19  ;;  %v1645_v20 = vsel %vm484_vm7, %v1630_v33, %v1632_v43  ;;  %v1644_v0 = vsel %vm484_vm7, %v1628_v23, %v1630_v33  ;;  %v3021_v23 = vld [vmem:[#allocation10 + $0x38] ss:$20 sps:$4 sm:$0xff]  }
 0x3fe   : > { %2755 = vmatprep.subr.bf16.mxu1 %v1637_v44 }
 0x3ff   : > { %2756 = vmatpush3.bf16.msra.mxu1 %v1437_v59 }
 0x400   : > { %2166 = vmatpush1.bf16.msra.mxu0 %v1641_v52  ;;  %v1418_v12 = vpop.permute.xlu0 %1417  ;;  %v1618_v13 = vpop.permute.xlu1 %1617 }
 0x401   : > { %v1440_v50 = vsel %vm448_vm5, %v4625_v22, %v1418_v12  ;;  %2167 = vmatprep.subr.bf16.mxu0 %v1645_v20  ;;  %v1640_v51 = vsel %vm484_vm7, %v4386_v2, %v1618_v13 }
 0x402   : > { %2757 = vmatprep.subr.bf16.mxu1 %v1640_v51 }
 0x403   : > { %2758 = vmatpush3.bf16.msra.mxu1 %v1440_v50 }
 0x404   : > { %2168 = vmatpush1.bf16.msra.mxu0 %v1644_v0  ;;  %v1426_v28 = vpop.permute.xlu0 %1425  ;;  %v1626_v45 = vpop.permute.xlu1 %1625 }
 0x405   : > { %v1443_v54 = vsel %vm448_vm5, %v4628_v5, %v1426_v28  ;;  %v1643_v53 = vsel %vm484_vm7, %v1624_v41, %v1626_v45  ;;  %v3020_v41 = vld [vmem:[#allocation10 + $0x10] ss:$20 sps:$4 sm:$0xff]  }
 0x406   : > { %2759 = vmatprep.subr.bf16.mxu1 %v1643_v53 }
 0x407   : > { %2170 = vmatmul.mubr.bf16.vlgmr.msra.gmra.mrb[0].mxu0 %v3008_v3  ;;  %2760 = vmatpush3.bf16.msra.mxu1 %v1443_v54 }
 0x408   : > { %v1434_v22 = vpop.permute.xlu0 %1433  ;;  %v1634_v60 = vpop.permute.xlu1 %1633  ;;  %2179 = vmatprep.mubr.bf16.mxu0 %v3011_v34 }
 0x409   : > { %v1446_v4 = vsel %vm448_vm5, %v4394_v35, %v1434_v22  ;;  %v1646_v55 = vsel %vm484_vm7, %v1632_v43, %v1634_v60  ;;  %v3017_v35 = vld [vmem:[#allocation10 + $0x84] ss:$20 sps:$4 sm:$0xff]  }
 0x40a   : > { %2761 = vmatprep.subr.bf16.mxu1 %v1646_v55 }
 0x40b   : > { %2762 = vmatpush3.bf16.msra.mxu1 %v1446_v4 }
 0x40c   : > { %v1708_v2 = vpop.permute.xlu0 %1707  ;;  %v1706_v26 = vpop.permute.xlu1 %1705 }
 0x40d   : > { %v1736_v5 = vsel %vm502_vm8, %v1706_v26, %v1708_v2 }
 0x40e   : > { %2210 = vmatprep.subr.bf16.mxu0 %v1736_v5  ;;  %2381 = vmatmul.mubr.bf16.vlgmr.msra.gmra.mrb[48].mxu1 %v3008_v3 }
 0x40f   : > { %2180 = vmatmul.mubr.bf16.gmra.mrb[4].mxu0 %v3013_v58  ;;  %2388 = vmatprep.mubr.bf16.mxu1 %v3011_v34 }
 0x410   : > { %v1714_v29 = vpop.permute.xlu0 %1713  ;;  %v1704_v62 = vpop.permute.xlu1 %1703  ;;  %2189 = vmatprep.mubr.bf16.mxu0 %v3014_v27 }
 0x411   : > { %v1735_v9 = vsel %vm502_vm8, %v1704_v62, %v1706_v26 }
 0x412   : > { %2211 = vmatpush1.bf16.msra.mxu0 %v1735_v9 }
 0x414   : > { %v1712_v16 = vpop.permute.xlu0 %1711  ;;  %v1716_v32 = vpop.permute.xlu1 %1715 }
 0x415   : > { %v1738_v47 = vsel %vm502_vm8, %v1712_v16, %v1714_v29  ;;  %v1739_v18 = vsel %vm502_vm8, %v1714_v29, %v1716_v32 }
 0x416   : > { %2212 = vmatprep.subr.bf16.mxu0 %v1739_v18  ;;  %2389 = vmatmul.mubr.bf16.gmra.mrb[52].mxu1 %v3013_v58 }
 0x417   : > { %2190 = vmatmul.mubr.bf16.gmra.mrb[8].mxu0 %v3016_v36  ;;  %2396 = vmatprep.mubr.bf16.mxu1 %v3014_v27 }
 0x418   : > { %2213 = vmatpush1.bf16.msra.mxu0 %v1738_v47  ;;  %v1724_v25 = vpop.permute.xlu0 %1723  ;;  %v1722_v11 = vpop.permute.xlu1 %1721  ;;  %2199 = vmatprep.mubr.bf16.mxu0 %v3017_v35 }
 0x419   : > { %v1742_v21 = vsel %vm502_vm8, %v1722_v11, %v1724_v25 }
 0x41a   : > { %2214 = vmatprep.subr.bf16.mxu0 %v1742_v21 }
 0x41c   : > { %v1730_v1 = vpop.permute.xlu0 %1729  ;;  %v1720_v24 = vpop.permute.xlu1 %1719 }
 0x41d   : > { %v1741_v39 = vsel %vm502_vm8, %v1720_v24, %v1722_v11 }
 0x41e   : > { %2215 = vmatpush1.bf16.msra.mxu0 %v1741_v39  ;;  %2397 = vmatmul.mubr.bf16.gmra.mrb[56].mxu1 %v3016_v36 }
 0x41f   : > { %2200 = vmatmul.mubr.bf16.gmra.mrb[12].mxu0 %v3019_v15  ;;  %2404 = vmatprep.mubr.bf16.mxu1 %v3017_v35 }
 0x420   : > { %v1728_v56 = vpop.permute.xlu0 %1727  ;;  %v1732_v37 = vpop.permute.xlu1 %1731  ;;  %2242 = vmatprep.mubr.bf16.mxu0 %v4632_v49 }
 0x421   : > { %v1744_v31 = vsel %vm502_vm8, %v1728_v56, %v1730_v1  ;;  %v1745_v63 = vsel %vm502_vm8, %v1730_v1, %v1732_v37 }
 0x422   : > { %2216 = vmatprep.subr.bf16.mxu0 %v1745_v63 }
 0x423   : > { %2217 = vmatpush1.bf16.msra.mxu0 %v1744_v31 }
 0x424   : > { %v1718_v42 = vpop.permute.xlu0 %1717  ;;  %v1710_v40 = vpop.permute.xlu1 %1709 }
 0x425   : > { %v1737_v6 = vsel %vm502_vm8, %v1708_v2, %v1710_v40  ;;  %v1740_v48 = vsel %vm502_vm8, %v1716_v32, %v1718_v42 }
 0x426   : > { %2405 = vmatmul.mubr.bf16.gmra.mrb[60].mxu1 %v3019_v15  ;;  %2795 = vmatprep.subr.bf16.mxu1 %v1737_v6 }
 0x427   : > { %2695 = vmatmul.mubr.msk.bf16.vlgmr.msra.gmra.mrb[0].mxu0 %vm2051_vm12, %v3020_v41  ;;  %2796 = vmatpush3.bf16.msra.mxu1 %v1737_v6 }
 0x428   : > { %2797 = vmatprep.subr.bf16.mxu1 %v1740_v48  ;;  %v1726_v57 = vpop.permute.xlu1 %1725  ;;  %2252 = vmatprep.mubr.bf16.mxu0 %v4632_v49  ;;  %v1734_v30 = vpop.permute.xlu0 %1733 }
 0x429   : > { %2803 = vmatprep.mubr.msk.bf16.mxu1 %vm2051_vm12, %v3020_v41  ;;  %v1743_v14 = vsel %vm502_vm8, %v1724_v25, %v1726_v57  ;;  %v1746_v33 = vsel %vm502_vm8, %v1732_v37, %v1734_v30 }
 0x42b   : > { %2798 = vmatpush3.bf16.msra.mxu1 %v1740_v48 }
 0x42c   : > { %2799 = vmatprep.subr.bf16.mxu1 %v1743_v14 }
 0x42f   : > { %2696 = vmatmul.mubr.msk.bf16.gmra.mrb[4].mxu0 %vm2051_vm12, %v3021_v23  ;;  %2800 = vmatpush3.bf16.msra.mxu1 %v1743_v14 }
 0x430   : > { %2801 = vmatprep.subr.bf16.mxu1 %v1746_v33  ;;  %2262 = vmatprep.mubr.bf16.mxu0 %v4632_v49 }
 0x433   : > { %2802 = vmatpush3.bf16.msra.mxu1 %v1746_v33 }
 0x436   : > { %2804 = vmatmul.mubr.msk.bf16.vlgmr.msra.gmra.mrb[64].mxu1 %vm2051_vm12, %v3021_v23 }
 0x437   : > { %2697 = vmatmul.mubr.msk.bf16.gmra.mrb[8].mxu0 %vm2051_vm12, %v3022_v61  ;;  %2807 = vmatprep.mubr.msk.bf16.mxu1 %vm2051_vm12, %v3022_v61 }
 0x438   : > { %2272 = vmatprep.mubr.bf16.mxu0 %v4632_v49 }
 0x439   : > { %v1914_v55 = vpop.permute.xlu1 %1913  ;;  %v1919_v5 = vpop.permute.xlu0 %1918 }
 0x43d   : > { %v1924_v35 = vpop.permute.xlu1 %1923  ;;  %v1929_v18 = vpop.permute.xlu0 %1928 }
 0x43e   : > { %2808 = vmatmul.mubr.msk.bf16.gmra.mrb[68].mxu1 %vm2051_vm12, %v3023_v7 }
 0x43f   : > { %2698 = vmatmul.mubr.msk.bf16.gmra.mrb[12].mxu0 %vm2051_vm12, %v3023_v7 }
 0x441   : > { %v4485_v37 = vpop.permute.xlu0 %1938  ;;  %v1934_v31 = vpop.permute.xlu1 %1933 }
 0x445   : > { %v4493_v30 = vpop.permute.xlu0 %1948  ;;  %v4495_v33 = vpop.permute.xlu1 %1943 }
 0x4a1   : > { %v2723_v8 = vpop.f32.mrb[32].mxu1 }
 0x4a2   : > { %v2724_v46 = vpop.f32.mrb[33].mxu1 }
 0x4a3   : > { %v2725_v38 = vadd.f32 %v2724_v46, %v2723_v8  ;;  %v2726_v17 = vpop.f32.mrb[34].mxu1 }
 0x4a4   : > { %v2727_v43 = vpop.f32.mrb[35].mxu1 }
 0x4a5   : > { %v2728_v10 = vadd.f32 %v2727_v43, %v2726_v17  ;;  %v2318_v2 = vadd.f32 %v2725_v38, %v1914_v55 }
 0x4a7   : > { %v2321_v62 = vadd.f32 %v2728_v10, %v1919_v5 }
 0x4a9   : > { %v2729_v19 = vpop.f32.mrb[36].mxu1 }
 0x4aa   : > { %v2730_v44 = vpop.f32.mrb[37].mxu1 }
 0x4ab   : > { %v2731_v59 = vadd.f32 %v2730_v44, %v2729_v19  ;;  %v2732_v52 = vpop.f32.mrb[38].mxu1 }
 0x4ac   : > { %v2733_v12 = vpop.f32.mrb[39].mxu1 }
 0x4ad   : > { %v2734_v20 = vadd.f32 %v2733_v12, %v2732_v52  ;;  %v2326_v25 = vadd.f32 %v2731_v59, %v1924_v35 }
 0x4af   : > { %v2329_v1 = vadd.f32 %v2734_v20, %v1929_v18 }
 0x4b1   : > { %v2735_v13 = vpop.f32.mrb[40].mxu1 }
 0x4b2   : > { %v2736_v50 = vpop.f32.mrb[41].mxu1 }
 0x4b3   : > { %v2737_v51 = vadd.f32 %v2736_v50, %v2735_v13  ;;  %v2738_v0 = vpop.f32.mrb[42].mxu1 }
 0x4b4   : > { %v2739_v3 = vpop.f32.mrb[43].mxu1 }
 0x4b5   : > { %v2740_v28 = vadd.f32 %v2739_v3, %v2738_v0  ;;  %v2334_v41 = vadd.f32 %v2737_v51, %v1934_v31 }
 0x4b7   : > { %v2337_v48 = vadd.f32 %v2740_v28, %v4485_v37 }
 0x4b9   : > { %v2741_v45 = vpop.f32.mrb[44].mxu1 }
 0x4ba   : > { %v2742_v34 = vpop.f32.mrb[45].mxu1 }
 0x4bb   : > { %v2743_v54 = vadd.f32 %v2742_v34, %v2741_v45  ;;  %v2744_v53 = vpop.f32.mrb[46].mxu1 }
 0x4bc   : > { %v2745_v22 = vpop.f32.mrb[47].mxu1 }
 0x4bd   : > { %v2746_v60 = vadd.f32 %v2745_v22, %v2744_v53  ;;  %v2342_v46 = vadd.f32 %v2743_v54, %v4495_v33 }
 0x4bf   : > { %v2345_v52 = vadd.f32 %v2746_v60, %v4493_v30 }
 0x4e1   : > { %v2763_v4 = vpop.f32.mrb[48].mxu1 }
 0x4e2   : > { %v2764_v58 = vpop.f32.mrb[49].mxu1 }
 0x4e3   : > { %v2765_v26 = vadd.f32 %v2764_v58, %v2763_v4  ;;  %v2766_v27 = vpop.f32.mrb[50].mxu1 }
 0x4e4   : > { %v2767_v29 = vpop.f32.mrb[51].mxu1 }
 0x4e5   : > { %v2768_v9 = vadd.f32 %v2767_v29, %v2766_v27  ;;  %v4481_v36 = vadd.f32 %v2765_v26, %v2318_v2 }
 0x4e7   : > { %v4483_v16 = vadd.f32 %v2768_v9, %v2321_v62 }
 0x4e9   : > { %v2769_v32 = vpop.f32.mrb[52].mxu1 }
 0x4ea   : > { %v2770_v47 = vpop.f32.mrb[53].mxu1 }
 0x4eb   : > { %v2771_v11 = vadd.f32 %v2770_v47, %v2769_v32  ;;  %v2772_v21 = vpop.f32.mrb[54].mxu1 }
 0x4ec   : > { %v2773_v15 = vpop.f32.mrb[55].mxu1 }
 0x4ed   : > { %v2774_v24 = vadd.f32 %v2773_v15, %v2772_v21  ;;  %v2391_v39 = vadd.f32 %v2771_v11, %v2326_v25 }
 0x4ef   : > { %v2394_v56 = vadd.f32 %v2774_v24, %v2329_v1 }
 0x4f1   : > { %v2775_v49 = vpop.f32.mrb[56].mxu1 }
 0x4f2   : > { %v2776_v63 = vpop.f32.mrb[57].mxu1 }
 0x4f3   : > { %v2777_v42 = vadd.f32 %v2776_v63, %v2775_v49  ;;  %v2778_v40 = vpop.f32.mrb[58].mxu1 }
 0x4f4   : > { %v2779_v6 = vpop.f32.mrb[59].mxu1 }
 0x4f5   : > { %v2780_v57 = vadd.f32 %v2779_v6, %v2778_v40  ;;  %v4488_v14 = vadd.f32 %v2777_v42, %v2334_v41 }
 0x4f7   : > { %v4491_v23 = vadd.f32 %v2780_v57, %v2337_v48 }
 0x4f9   : > { %v2781_v61 = vpop.f32.mrb[60].mxu1 }
 0x4fa   : > { %v2244_v7 = vpop.f32.mrb[0].mxu0  ;;  %v2782_v8 = vpop.f32.mrb[61].mxu1 }
 0x4fb   : > { %v2811_v38 = vadd.f32 %v2244_v7, %v1914_v55  ;;  %v2246_v17 = vpop.f32.mrb[1].mxu0  ;;  %v2783_v43 = vadd.f32 %v2782_v8, %v2781_v61  ;;  %v2784_v10 = vpop.f32.mrb[62].mxu1 }
 0x4fc   : > { %v2812_v19 = vadd.f32 %v2246_v17, %v1914_v55  ;;  %v2248_v44 = vpop.f32.mrb[2].mxu0  ;;  %v2785_v59 = vpop.f32.mrb[63].mxu1 }
 0x4fd   : > { %2478 = vst [vmem:[%s4499_s9] sm:$0xff] %v2811_v38  ;;  %v2813_v12 = vadd.f32 %v2248_v44, %v1919_v5  ;;  %v2250_v20 = vpop.f32.mrb[3].mxu0  ;;  %v2786_v13 = vadd.f32 %v2785_v59, %v2784_v10  ;;  %v2407_v50 = vadd.f32 %v2783_v43, %v2342_v46 }
 0x4fe   : > { %2479 = vst [vmem:[%s4499_s9 + $0x8] sm:$0xff] %v2812_v19  ;;  %v2814_v51 = vadd.f32 %v2250_v20, %v1919_v5 }
 0x4ff   : > { %2481 = vst [vmem:[%s4499_s9 + $0x18] sm:$0xff] %v2813_v12  ;;  %v2410_v0 = vadd.f32 %v2786_v13, %v2345_v52 }
 0x500   : > { %2482 = vst [vmem:[%s4499_s9 + $0x20] sm:$0xff] %v2814_v51 }
 0x502   : > { %v2254_v3 = vpop.f32.mrb[4].mxu0 }
 0x503   : > { %v2815_v28 = vadd.f32 %v2254_v3, %v1924_v35  ;;  %v2256_v45 = vpop.f32.mrb[5].mxu0 }
 0x504   : > { %v2816_v34 = vadd.f32 %v2256_v45, %v1924_v35  ;;  %v2258_v54 = vpop.f32.mrb[6].mxu0 }
 0x505   : > { %2484 = vst [vmem:[%s4499_s9 + $0x30] sm:$0xff] %v2815_v28  ;;  %v2817_v53 = vadd.f32 %v2258_v54, %v1929_v18  ;;  %v2260_v22 = vpop.f32.mrb[7].mxu0 }
 0x506   : > { %2485 = vst [vmem:[%s4499_s9 + $0x38] sm:$0xff] %v2816_v34  ;;  %v2818_v60 = vadd.f32 %v2260_v22, %v1929_v18 }
 0x507   : > { %2487 = vst [vmem:[%s4499_s9 + $0x48] sm:$0xff] %v2817_v53 }
 0x508   : > { %2488 = vst [vmem:[%s4499_s9 + $0x50] sm:$0xff] %v2818_v60 }
 0x509   : > { %v2805_v4 = vpop.f32.mrb[64].mxu1 }
 0x50a   : > { %v2264_v55 = vpop.f32.mrb[8].mxu0  ;;  %v2456_v58 = vadd.f32 %v2805_v4, %v2391_v39  ;;  %v2447_v2 = vpop.f32.mrb[65].mxu1 }
 0x50b   : > { %v2819_v26 = vadd.f32 %v2264_v55, %v1934_v31  ;;  %v2266_v27 = vpop.f32.mrb[9].mxu0  ;;  %v2448_v5 = vadd.f32 %v2447_v2, %v4481_v36  ;;  %v2806_v29 = vpop.f32.mrb[66].mxu1 }
 0x50c   : > { %2486 = vst [vmem:[%s4499_s9 + $0x40] sm:$0xff] %v2456_v58  ;;  %v2820_v62 = vadd.f32 %v2266_v27, %v1934_v31  ;;  %v2268_v9 = vpop.f32.mrb[10].mxu0  ;;  %v2459_v32 = vadd.f32 %v2806_v29, %v2394_v56  ;;  %v2450_v35 = vpop.f32.mrb[67].mxu1 }
 0x50d   : > { %2490 = vst [vmem:[%s4499_s9 + $0x60] sm:$0xff] %v2819_v26  ;;  %2480 = vst [vmem:[%s4499_s9 + $0x10] sm:$0xff] %v2448_v5  ;;  %v2821_v47 = vadd.f32 %v2268_v9, %v4485_v37  ;;  %v2270_v18 = vpop.f32.mrb[11].mxu0  ;;  %v2451_v25 = vadd.f32 %v2450_v35, %v4483_v16 }
 0x50e   : > { %2491 = vst [vmem:[%s4499_s9 + $0x68] sm:$0xff] %v2820_v62  ;;  %2489 = vst [vmem:[%s4499_s9 + $0x58] sm:$0xff] %v2459_v32  ;;  %v2822_v36 = vadd.f32 %v2270_v18, %v4485_v37 }
 0x50f   : > { %2493 = vst [vmem:[%s4499_s9 + $0x78] sm:$0xff] %v2821_v47  ;;  %2483 = vst [vmem:[%s4499_s9 + $0x28] sm:$0xff] %v2451_v25 }
 0x510   : > { %2494 = vst [vmem:[%s4499_s9 + $0x80] sm:$0xff] %v2822_v36 }
 0x511   : > { %v2809_v11 = vpop.f32.mrb[68].mxu1 }
 0x512   : > { %v2274_v21 = vpop.f32.mrb[12].mxu0  ;;  %v2472_v15 = vadd.f32 %v2809_v11, %v2407_v50  ;;  %v2463_v1 = vpop.f32.mrb[69].mxu1 }
 0x513   : > { %v2823_v24 = vadd.f32 %v2274_v21, %v4495_v33  ;;  %v2276_v16 = vpop.f32.mrb[13].mxu0  ;;  %v2464_v39 = vadd.f32 %v2463_v1, %v4488_v14  ;;  %v2810_v56 = vpop.f32.mrb[70].mxu1 }
 0x514   : > { %2498 = vst [vmem:[%s4499_s9 + $0xa0] sm:$0xff] %v2472_v15  ;;  %v2824_v37 = vadd.f32 %v2276_v16, %v4495_v33  ;;  %v2278_v49 = vpop.f32.mrb[14].mxu0  ;;  %v2475_v31 = vadd.f32 %v2810_v56, %v2410_v0  ;;  %v2466_v63 = vpop.f32.mrb[71].mxu1 }
 0x515   : > { %2496 = vst [vmem:[%s4499_s9 + $0x90] sm:$0xff] %v2823_v24  ;;  %2492 = vst [vmem:[%s4499_s9 + $0x70] sm:$0xff] %v2464_v39  ;;  %v2825_v41 = vadd.f32 %v2278_v49, %v4493_v30  ;;  %v2280_v42 = vpop.f32.mrb[15].mxu0  ;;  %v2467_v40 = vadd.f32 %v2466_v63, %v4491_v23 }
 0x516   : > { %2497 = vst [vmem:[%s4499_s9 + $0x98] sm:$0xff] %v2824_v37  ;;  %2501 = vst [vmem:[%s4499_s9 + $0xb8] sm:$0xff] %v2475_v31  ;;  %v2826_v6 = vadd.f32 %v2280_v42, %v4493_v30 }
 0x517   : > { %2499 = vst [vmem:[%s4499_s9 + $0xa8] sm:$0xff] %v2825_v41  ;;  %2495 = vst [vmem:[%s4499_s9 + $0x88] sm:$0xff] %v2467_v40 }
 0x518   : > { %2500 = vst [vmem:[%s4499_s9 + $0xb0] sm:$0xff] %v2826_v6 }
 0x519   : > { %3207 = shalt.err (!%p3204_p8)
}
 0x51a   : > { %s3208_s13 = scalar_lea.hbm %s4534_s28, 3072  ;;  %s3212_s15 = scalar_lea.hbm %s4592_s6, 6144 }
 0x51b   : > { %p3209_p6 = scmp.ne.s32.totalorder %s4534_s28, %s3208_s13  ;;  %p3213_p3 = scmp.lt.u32.totalorder %s4534_s28, %s4592_s6 }
 0x51c   : > { %p3214_p0 = scmp.lt.u32.totalorder %s3212_s15, %s3208_s13  ;;  %p3216_p2 = scmp.lt.u32.totalorder %s3208_s13, %s4534_s28 }
 0x51d   : > { %p3210_p9 = pnand %p3209_p6, %p4633_p7 }
 0x51e   : > { %p3215_p5 = por %p3214_p0, %p3213_p3 }
 0x51f   : > { %p3211_p4 = pneg %p3210_p9 }
 0x520   : > { %p3217_p10 = por %p3216_p2, %p3215_p5 }
 0x522   : > { %p3218_p1 = pnand %p3217_p10, %p3211_p4 }
 0x524   : > { %3221 = shalt.err (!%p3218_p1)
}
 0x525   : > { %s3297_s27 = smov 384   ;;  %s3298_s18 = smov 24  }
 0x526   : > { %2883 = dma.vmem_to_hbm [thread:$0]  (%p4633_p7), %s4536_s12, 3072, %s4534_s28, %s2503_s17, %s3297_s27, %s3297_s27, %s3298_s18  }
 0x527 PF: > { %s2531_s14 = sand.u32 1, %s3260_s21   ;;  %p4634_p11 = scmp.ne.s32.totalorder %s4609_s29, 0 }
 0x528   : > { %p4635_p12 = scmp.ge.s32.totalorder %s3272_s24, 2  ;;  %s2532_s19 = scalar_lea.sflag [#allocation6], %s2531_s14 }
 0x52a   : > { %p2906_p13 = pnand %p4635_p12, %p4634_p11 }
 0x52c   : > { %3255 = dma.done.wait (!%p2906_p13), %s2532_s19, 3072  }
 0x52d   : > { %3257 = vsyncadd (!%p2906_p13), %s2532_s19, 4294964224  ;;  %p22_p8 = scmp.ge.s32.totalorder %s3497_s7, 4   ;;  %s4636_s21 = smov %s3264_s22 }
 0x52e   : > { %s4637_s22 = smov %s3268_s23  ;;  %s4638_s23 = smov %s3509_s30 }
 0x52f   : > { %s4639_s24 = smov %s3497_s7  ;;  %24 = sbr.rel (!%p22_p8) target bundleno = 8 (0x8), region = 109 }
 0x536   :  { %2537 = vsyncpa [#allocation5], 1 }
 0x537   :  { %2539 = vsyncpa [#allocation5 + $0x1], 1 }
 0x538   :  { %2540 = vsyncpa [#allocation8], 1 }
 0x539   :  { %2541 = vsyncpa [#allocation11], 1 }
 0x53a   :  { %2542 = vsyncpa [#allocation14], 1 }
 0x53b   :  { %2543 = vsyncpa [#allocation6], 1 }
 0x53c   :  { %2545 = vsyncpa [#allocation6 + $0x1], 1 }

</bundles_post_ra>
